<compile_context>
chip_gen: v7x
topology: tpu7x:2x2x1
jax: 0.10.0
libtpu: 0.0.40
codegen_flags: <defaults>
</compile_context>

<pallas_src>
import functools
import math

import jax
import jax.numpy as jnp
from jax.experimental import pallas as pl
from jax.experimental.pallas import tpu as pltpu


# ----------------------------- in-kernel helpers --------------------------------

def _layernorm(x, gamma, beta, eps=1e-6):
    # x: (R, C) f32; gamma/beta: (C,) f32
    mu = jnp.mean(x, axis=-1, keepdims=True)
    xc = x - mu
    var = jnp.mean(xc * xc, axis=-1, keepdims=True)
    return xc * jax.lax.rsqrt(var + eps) * gamma + beta


def _linear(x, w_bf16, b_f32):
    # x: (R, in) f32; w: (in, out) bf16 (pre-transposed & pre-cast in the wrapper);
    # bf16 operands -> native MXU path, f32 accumulation.
    y = jnp.dot(x.astype(jnp.bfloat16), w_bf16, preferred_element_type=jnp.float32)
    return y + b_f32


def _gelu_exact(x):
    # matches torch.nn.GELU() default (erf form)
    return 0.5 * x * (1.0 + jax.lax.erf(x * (1.0 / math.sqrt(2.0))))


def _softmax_last(x):
    x = x - jnp.max(x, axis=-1, keepdims=True)
    e = jnp.exp(x)
    return e * pl.reciprocal(jnp.sum(e, axis=-1, keepdims=True), approx=True)


# ----------------------------- fused encoder kernel -----------------------------

def encoder_stack_kernel(x_ref,
                         n1g_ref, n1b_ref,
                         wqkv_ref, bqkv_ref,
                         wproj_ref, bproj_ref,
                         n2g_ref, n2b_ref,
                         w1_ref, b1_ref,
                         w2_ref, b2_ref,
                         o_ref, *, num_heads):
    # One grid step == one encoder layer.  Activations stay resident in o_ref (VMEM)
    # across the depth axis; weights for layer d are streamed in by their BlockSpecs.
    @pl.when(pl.program_id(0) == 0)
    def _():
        o_ref[...] = x_ref[...]

    B, N, C = o_ref.shape
    H = num_heads
    Dh = C // H
    scale = Dh ** -0.5

    x = o_ref[...].reshape(B * N, C)                      # (R, C) f32 residual stream

    # ---- attention branch: x = x + proj(MHSA(LN1(x))) ----
    xn = _layernorm(x, n1g_ref[0, 0], n1b_ref[0, 0])
    qkv = _linear(xn, wqkv_ref[0], bqkv_ref[0, 0])        # (R, 3C) = [q | k | v]
    q2d = qkv[:, 0 * C:1 * C] * scale                     # fold scale into q (cheaper than on scores)
    k2d = qkv[:, 1 * C:2 * C]
    v2d = qkv[:, 2 * C:3 * C]

    heads = []
    for h in range(H):                                    # static unroll: H is small
        sl = slice(h * Dh, (h + 1) * Dh)
        qh = q2d[:, sl].reshape(B, N, Dh).astype(jnp.bfloat16)
        kh = k2d[:, sl].reshape(B, N, Dh).astype(jnp.bfloat16)
        vh = v2d[:, sl].reshape(B, N, Dh).astype(jnp.bfloat16)
        s = jnp.einsum('bnd,bmd->bnm', qh, kh,
                       preferred_element_type=jnp.float32)              # (B, N, N) f32
        p = _softmax_last(s)
        ctx_h = jnp.einsum('bnm,bmd->bnd', p.astype(jnp.bfloat16), vh,
                           preferred_element_type=jnp.float32)          # (B, N, Dh) f32
        heads.append(ctx_h.reshape(B * N, Dh))
    ctx = jnp.concatenate(heads, axis=-1)                 # (R, C)

    x = x + _linear(ctx, wproj_ref[0], bproj_ref[0, 0])

    # ---- mlp branch: x = x + fc2(GELU(fc1(LN2(x)))) ----
    xn2 = _layernorm(x, n2g_ref[0, 0], n2b_ref[0, 0])
    hid = _gelu_exact(_linear(xn2, w1_ref[0], b1_ref[0, 0]))
    x = x + _linear(hid, w2_ref[0], b2_ref[0, 0])

    o_ref[...] = x.reshape(B, N, C)


# ----------------------------- wrapper -------------------------------------------

PARAM_ORDER = ('n1_g', 'n1_b', 'qkv_w', 'qkv_b', 'proj_w', 'proj_b',
               'n2_g', 'n2_b', 'fc1_w', 'fc1_b', 'fc2_w', 'fc2_b')
WEIGHT_KEYS = ('qkv_w', 'proj_w', 'fc1_w', 'fc2_w')


def prepare_params(torch_params):
    """Convert torch-layout f32 params to the kernel layout:
    matmul weights (depth, out, in) -> (depth, in, out), cast to bf16 (halves the per-layer
    weight DMA; the kernel consumed bf16 operands anyway).  Biases / LN affine stay f32."""
    p = dict(torch_params)
    for k in WEIGHT_KEYS:
        p[k] = jnp.transpose(p[k], (0, 2, 1)).astype(jnp.bfloat16)
    return p


def point_transformer_encoder(x, pos, prepared_params, *, num_heads):
    # Reference forward computes idx = knn_point(k, pos, pos), but 'attn'-only blocks never
    # consume it -> dead compute, dropped.
    del pos
    B, N, C = x.shape
    depth = prepared_params['qkv_w'].shape[0]

    def layer_spec(arr):
        nd = arr.ndim
        return pl.BlockSpec((1,) + tuple(arr.shape[1:]),
                            lambda d, _nd=nd: (d,) + (0,) * (_nd - 1))

    act_spec = pl.BlockSpec((B, N, C), lambda d: (0, 0, 0))   # resident across depth

    return pl.pallas_call(
        functools.partial(encoder_stack_kernel, num_heads=num_heads),
        out_shape=jax.ShapeDtypeStruct((B, N, C), jnp.float32),
        grid=(depth,),
        in_specs=[act_spec] + [layer_spec(prepared_params[k]) for k in PARAM_ORDER],
        out_specs=act_spec,
        compiler_params=pltpu.CompilerParams(
            dimension_semantics=("arbitrary",)),   # output revisited every layer
    )(x, *(prepared_params[k] for k in PARAM_ORDER))


# ----------------------------- parameter init -------------------------------------

def init_params(key, depth, dim, hidden):
    # timm trunc_normal_(std=0.02) ~= N(0, 0.02); biases / LN betas zero, LN gammas one.
    # Weights are in torch nn.Linear layout (out, in); prepare_params() converts for the kernel.
    ks = jax.random.split(key, 4)
    tn = lambda k, s: (jax.random.normal(k, s, jnp.float32) * 0.02).astype(jnp.float32)
    z = lambda s: jnp.zeros(s, jnp.float32)
    return dict(
        n1_g=jnp.ones((depth, 1, dim), jnp.float32), n1_b=z((depth, 1, dim)),
        qkv_w=tn(ks[0], (depth, 3 * dim, dim)),      qkv_b=z((depth, 1, 3 * dim)),
        proj_w=tn(ks[1], (depth, dim, dim)),         proj_b=z((depth, 1, dim)),
        n2_g=jnp.ones((depth, 1, dim), jnp.float32), n2_b=z((depth, 1, dim)),
        fc1_w=tn(ks[2], (depth, hidden, dim)),       fc1_b=z((depth, 1, hidden)),
        fc2_w=tn(ks[3], (depth, dim, hidden)),       fc2_b=z((depth, 1, dim)),
    )


# ----------------------------- main ------------------------------------------------

if __name__ == "__main__":
    # small shapes consistent with the module's forward: x (B, N, C), pos (B, N, 3)
    B, N, C = 2, 16, 128          # C chosen lane-dense (multiple of 128)
    num_heads = 4                 # module default
    depth = 2                     # block_style_list = ['attn', 'attn']
    mlp_ratio = 4.0
    hidden = int(C * mlp_ratio)

    key = jax.random.PRNGKey(0)
    kx, kp, kw = jax.random.split(key, 3)
    x = jax.random.normal(kx, (B, N, C), jnp.float32)
    pos = jax.random.normal(kp, (B, N, 3), jnp.float32)

    params = prepare_params(init_params(kw, depth, C, hidden))

    out = point_transformer_encoder(x, pos, params, num_heads=num_heads)
    out = jax.block_until_ready(out)
    assert out.shape == (B, N, C) and out.dtype == jnp.float32
    assert bool(jnp.all(jnp.isfinite(out)))
    print("KERNEL_OK")
</pallas_src>

<mosaic_0001>
module attributes {stable_mosaic.version = 11 : i64} {
  func.func @encoder_stack_kernel(%arg0: i32, %arg1: memref<2x16x128xf32, #tpu.memory_space<vmem>>, %arg2: memref<1x1x128xf32, #tpu.memory_space<vmem>>, %arg3: memref<1x1x128xf32, #tpu.memory_space<vmem>>, %arg4: memref<1x128x384xbf16, #tpu.memory_space<vmem>>, %arg5: memref<1x1x384xf32, #tpu.memory_space<vmem>>, %arg6: memref<1x128x128xbf16, #tpu.memory_space<vmem>>, %arg7: memref<1x1x128xf32, #tpu.memory_space<vmem>>, %arg8: memref<1x1x128xf32, #tpu.memory_space<vmem>>, %arg9: memref<1x1x128xf32, #tpu.memory_space<vmem>>, %arg10: memref<1x128x512xbf16, #tpu.memory_space<vmem>>, %arg11: memref<1x1x512xf32, #tpu.memory_space<vmem>>, %arg12: memref<1x512x128xbf16, #tpu.memory_space<vmem>>, %arg13: memref<1x1x128xf32, #tpu.memory_space<vmem>>, %arg14: memref<2x16x128xf32, #tpu.memory_space<vmem>>) attributes {dimension_semantics = [#tpu.dimension_semantics<arbitrary>], iteration_bounds = array<i64: 2>, scalar_prefetch = 0 : i64, scratch_operands = 0 : i64, tpu.core_type = #tpu.core_type<tc>, window_params = [{pipeline_mode = #tpu.pipeline_mode<synchronous>, transform_indices = @transform_0, window_bounds = array<i64: 2, 16, 128>}, {transform_indices = @transform_1, window_bounds = array<i64: 1, 1, 128>}, {transform_indices = @transform_2, window_bounds = array<i64: 1, 1, 128>}, {transform_indices = @transform_3, window_bounds = array<i64: 1, 128, 384>}, {transform_indices = @transform_4, window_bounds = array<i64: 1, 1, 384>}, {transform_indices = @transform_5, window_bounds = array<i64: 1, 128, 128>}, {transform_indices = @transform_6, window_bounds = array<i64: 1, 1, 128>}, {transform_indices = @transform_7, window_bounds = array<i64: 1, 1, 128>}, {transform_indices = @transform_8, window_bounds = array<i64: 1, 1, 128>}, {transform_indices = @transform_9, window_bounds = array<i64: 1, 128, 512>}, {transform_indices = @transform_10, window_bounds = array<i64: 1, 1, 512>}, {transform_indices = @transform_11, window_bounds = array<i64: 1, 512, 128>}, {transform_indices = @transform_12, window_bounds = array<i64: 1, 1, 128>}, {pipeline_mode = #tpu.pipeline_mode<synchronous>, transform_indices = @transform_13, window_bounds = array<i64: 2, 16, 128>}]} {
    %c0_i32 = arith.constant 0 : i32
    %0 = arith.cmpi eq, %arg0, %c0_i32 : i32
    %1 = arith.extui %0 : i1 to i32
    %c0_i32_0 = arith.constant 0 : i32
    %2 = arith.cmpi ne, %1, %c0_i32_0 : i32
    scf.if %2 {
      %c0_75 = arith.constant 0 : index
      %c0_76 = arith.constant 0 : index
      %c0_77 = arith.constant 0 : index
      %203 = vector.load %arg1[%c0_75, %c0_76, %c0_77] : memref<2x16x128xf32, #tpu.memory_space<vmem>>, vector<2x16x128xf32>
      %c0_78 = arith.constant 0 : index
      %c0_79 = arith.constant 0 : index
      %c0_80 = arith.constant 0 : index
      %204 = vector.load %arg14[%c0_78, %c0_79, %c0_80] : memref<2x16x128xf32, #tpu.memory_space<vmem>>, vector<2x16x128xf32>
      tpu.vector_store %arg14[%c0_78, %c0_79, %c0_80], %203 {strides = array<i32>} : memref<2x16x128xf32, #tpu.memory_space<vmem>>, vector<2x16x128xf32>,
    } else {
    }
    %c0 = arith.constant 0 : index
    %c0_1 = arith.constant 0 : index
    %c0_2 = arith.constant 0 : index
    %3 = vector.load %arg14[%c0, %c0_1, %c0_2] : memref<2x16x128xf32, #tpu.memory_space<vmem>>, vector<2x16x128xf32>
    %4 = vector.shape_cast %3 : vector<2x16x128xf32> to vector<32x128xf32>
    %c0_3 = arith.constant 0 : index
    %c0_4 = arith.constant 0 : index
    %c0_5 = arith.constant 0 : index
    %5 = vector.load %arg2[%c0_3, %c0_4, %c0_5] : memref<1x1x128xf32, #tpu.memory_space<vmem>>, vector<1x1x128xf32>
    %6 = vector.shape_cast %5 : vector<1x1x128xf32> to vector<128xf32>
    %c0_6 = arith.constant 0 : index
    %c0_7 = arith.constant 0 : index
    %c0_8 = arith.constant 0 : index
    %7 = vector.load %arg3[%c0_6, %c0_7, %c0_8] : memref<1x1x128xf32, #tpu.memory_space<vmem>>, vector<1x1x128xf32>
    %8 = vector.shape_cast %7 : vector<1x1x128xf32> to vector<128xf32>
    %cst = arith.constant dense<0.000000e+00> : vector<32xf32>
    %9 = vector.multi_reduction <add>, %4, %cst [1] : vector<32x128xf32> to vector<32xf32>
    %10 = vector.shape_cast %9 : vector<32xf32> to vector<32x1xf32>
    %cst_9 = arith.constant 1.280000e+02 : f32
    %11 = vector.broadcast %cst_9 : f32 to vector<32x1xf32>
    %12 = arith.divf %10, %11 : vector<32x1xf32>
    %13 = vector.broadcast %12 : vector<32x1xf32> to vector<32x128xf32>
    %14 = arith.subf %4, %13 : vector<32x128xf32>
    %15 = arith.mulf %14, %14 : vector<32x128xf32>
    %cst_10 = arith.constant dense<0.000000e+00> : vector<32xf32>
    %16 = vector.multi_reduction <add>, %15, %cst_10 [1] : vector<32x128xf32> to vector<32xf32>
    %17 = vector.shape_cast %16 : vector<32xf32> to vector<32x1xf32>
    %cst_11 = arith.constant 1.280000e+02 : f32
    %18 = vector.broadcast %cst_11 : f32 to vector<32x1xf32>
    %19 = arith.divf %17, %18 : vector<32x1xf32>
    %cst_12 = arith.constant 9.99999997E-7 : f32
    %20 = vector.broadcast %cst_12 : f32 to vector<32x1xf32>
    %21 = arith.addf %19, %20 : vector<32x1xf32>
    %22 = math.rsqrt %21 : vector<32x1xf32>
    %23 = vector.broadcast %22 : vector<32x1xf32> to vector<32x128xf32>
    %24 = arith.mulf %14, %23 : vector<32x128xf32>
    %25 = vector.shape_cast %6 : vector<128xf32> to vector<1x128xf32>
    %26 = vector.broadcast %25 : vector<1x128xf32> to vector<32x128xf32>
    %27 = arith.mulf %24, %26 : vector<32x128xf32>
    %28 = vector.shape_cast %8 : vector<128xf32> to vector<1x128xf32>
    %29 = vector.broadcast %28 : vector<1x128xf32> to vector<32x128xf32>
    %30 = arith.addf %27, %29 : vector<32x128xf32>
    %c0_13 = arith.constant 0 : index
    %c0_14 = arith.constant 0 : index
    %c0_15 = arith.constant 0 : index
    %31 = vector.load %arg4[%c0_13, %c0_14, %c0_15] : memref<1x128x384xbf16, #tpu.memory_space<vmem>>, vector<1x128x384xbf16>
    %32 = vector.shape_cast %31 : vector<1x128x384xbf16> to vector<128x384xbf16>
    %c0_16 = arith.constant 0 : index
    %c0_17 = arith.constant 0 : index
    %c0_18 = arith.constant 0 : index
    %33 = vector.load %arg5[%c0_16, %c0_17, %c0_18] : memref<1x1x384xf32, #tpu.memory_space<vmem>>, vector<1x1x384xf32>
    %34 = vector.shape_cast %33 : vector<1x1x384xf32> to vector<384xf32>
    %35 = arith.truncf %30 : vector<32x128xf32> to vector<32x128xbf16>
    %cst_19 = arith.constant dense<0.000000e+00> : vector<32x384xf32>
    %36 = tpu.matmul %35, %32, %cst_19 {dimension_numbers = #tpu.dot_dimension_numbers<[1], [0], [0], [1], [0, 0, 1, 1], [], []>} : vector<32x128xbf16>, vector<128x384xbf16>, vector<32x384xf32> -> vector<32x384xf32>
    %37 = vector.shape_cast %34 : vector<384xf32> to vector<1x384xf32>
    %38 = vector.broadcast %37 : vector<1x384xf32> to vector<32x384xf32>
    %39 = arith.addf %36, %38 : vector<32x384xf32>
    %40 = vector.extract_strided_slice %39 {offsets = [0, 0], sizes = [32, 128], strides = [1, 1]} : vector<32x384xf32> to vector<32x128xf32>
    %cst_20 = arith.constant 0.176776692 : f32
    %41 = vector.broadcast %cst_20 : f32 to vector<32x128xf32>
    %42 = arith.mulf %40, %41 : vector<32x128xf32>
    %43 = vector.extract_strided_slice %39 {offsets = [0, 128], sizes = [32, 128], strides = [1, 1]} : vector<32x384xf32> to vector<32x128xf32>
    %44 = vector.extract_strided_slice %39 {offsets = [0, 256], sizes = [32, 128], strides = [1, 1]} : vector<32x384xf32> to vector<32x128xf32>
    %45 = vector.extract_strided_slice %42 {offsets = [0, 0], sizes = [32, 32], strides = [1, 1]} : vector<32x128xf32> to vector<32x32xf32>
    %46 = vector.shape_cast %45 : vector<32x32xf32> to vector<2x16x32xf32>
    %47 = arith.truncf %46 : vector<2x16x32xf32> to vector<2x16x32xbf16>
    %48 = vector.extract_strided_slice %43 {offsets = [0, 0], sizes = [32, 32], strides = [1, 1]} : vector<32x128xf32> to vector<32x32xf32>
    %49 = vector.shape_cast %48 : vector<32x32xf32> to vector<2x16x32xf32>
    %50 = arith.truncf %49 : vector<2x16x32xf32> to vector<2x16x32xbf16>
    %51 = vector.extract_strided_slice %44 {offsets = [0, 0], sizes = [32, 32], strides = [1, 1]} : vector<32x128xf32> to vector<32x32xf32>
    %52 = vector.shape_cast %51 : vector<32x32xf32> to vector<2x16x32xf32>
    %53 = arith.truncf %52 : vector<2x16x32xf32> to vector<2x16x32xbf16>
    "tpu.trace_start"() <{level = 10 : i32, message = "bnd,bmd->bnm"}> : () -> ()
    %cst_21 = arith.constant dense<0.000000e+00> : vector<2x16x16xf32>
    %54 = tpu.matmul %47, %50, %cst_21 {dimension_numbers = #tpu.dot_dimension_numbers<[2], [2], [1], [1], [0, 0, 0, 1, 1, 1], [0], [0]>} : vector<2x16x32xbf16>, vector<2x16x32xbf16>, vector<2x16x16xf32> -> vector<2x16x16xf32>
    "tpu.trace_stop"() : () -> ()
    %cst_22 = arith.constant dense<0xFF800000> : vector<2x16xf32>
    %55 = vector.multi_reduction <maximumf>, %54, %cst_22 [2] : vector<2x16x16xf32> to vector<2x16xf32>
    %56 = vector.shape_cast %55 : vector<2x16xf32> to vector<2x16x1xf32>
    %57 = vector.broadcast %56 : vector<2x16x1xf32> to vector<2x16x16xf32>
    %58 = arith.subf %54, %57 : vector<2x16x16xf32>
    %59 = math.exp %58 : vector<2x16x16xf32>
    %cst_23 = arith.constant dense<0.000000e+00> : vector<2x16xf32>
    %60 = vector.multi_reduction <add>, %59, %cst_23 [2] : vector<2x16x16xf32> to vector<2x16xf32>
    %61 = vector.shape_cast %60 : vector<2x16xf32> to vector<2x16x1xf32>
    %62 = tpu.reciprocal %61 {approx = true} : vector<2x16x1xf32> -> vector<2x16x1xf32>
    %63 = vector.broadcast %62 : vector<2x16x1xf32> to vector<2x16x16xf32>
    %64 = arith.mulf %59, %63 : vector<2x16x16xf32>
    %65 = arith.truncf %64 : vector<2x16x16xf32> to vector<2x16x16xbf16>
    "tpu.trace_start"() <{level = 10 : i32, message = "bnm,bmd->bnd"}> : () -> ()
    %cst_24 = arith.constant dense<0.000000e+00> : vector<2x16x32xf32>
    %66 = tpu.matmul %65, %53, %cst_24 {dimension_numbers = #tpu.dot_dimension_numbers<[2], [1], [1], [2], [0, 0, 0, 1, 1, 2], [0], [0]>} : vector<2x16x16xbf16>, vector<2x16x32xbf16>, vector<2x16x32xf32> -> vector<2x16x32xf32>
    "tpu.trace_stop"() : () -> ()
    %67 = vector.shape_cast %66 : vector<2x16x32xf32> to vector<32x32xf32>
    %68 = vector.extract_strided_slice %42 {offsets = [0, 32], sizes = [32, 32], strides = [1, 1]} : vector<32x128xf32> to vector<32x32xf32>
    %69 = vector.shape_cast %68 : vector<32x32xf32> to vector<2x16x32xf32>
    %70 = arith.truncf %69 : vector<2x16x32xf32> to vector<2x16x32xbf16>
    %71 = vector.extract_strided_slice %43 {offsets = [0, 32], sizes = [32, 32], strides = [1, 1]} : vector<32x128xf32> to vector<32x32xf32>
    %72 = vector.shape_cast %71 : vector<32x32xf32> to vector<2x16x32xf32>
    %73 = arith.truncf %72 : vector<2x16x32xf32> to vector<2x16x32xbf16>
    %74 = vector.extract_strided_slice %44 {offsets = [0, 32], sizes = [32, 32], strides = [1, 1]} : vector<32x128xf32> to vector<32x32xf32>
    %75 = vector.shape_cast %74 : vector<32x32xf32> to vector<2x16x32xf32>
    %76 = arith.truncf %75 : vector<2x16x32xf32> to vector<2x16x32xbf16>
    "tpu.trace_start"() <{level = 10 : i32, message = "bnd,bmd->bnm"}> : () -> ()
    %cst_25 = arith.constant dense<0.000000e+00> : vector<2x16x16xf32>
    %77 = tpu.matmul %70, %73, %cst_25 {dimension_numbers = #tpu.dot_dimension_numbers<[2], [2], [1], [1], [0, 0, 0, 1, 1, 1], [0], [0]>} : vector<2x16x32xbf16>, vector<2x16x32xbf16>, vector<2x16x16xf32> -> vector<2x16x16xf32>
    "tpu.trace_stop"() : () -> ()
    %cst_26 = arith.constant dense<0xFF800000> : vector<2x16xf32>
    %78 = vector.multi_reduction <maximumf>, %77, %cst_26 [2] : vector<2x16x16xf32> to vector<2x16xf32>
    %79 = vector.shape_cast %78 : vector<2x16xf32> to vector<2x16x1xf32>
    %80 = vector.broadcast %79 : vector<2x16x1xf32> to vector<2x16x16xf32>
    %81 = arith.subf %77, %80 : vector<2x16x16xf32>
    %82 = math.exp %81 : vector<2x16x16xf32>
    %cst_27 = arith.constant dense<0.000000e+00> : vector<2x16xf32>
    %83 = vector.multi_reduction <add>, %82, %cst_27 [2] : vector<2x16x16xf32> to vector<2x16xf32>
    %84 = vector.shape_cast %83 : vector<2x16xf32> to vector<2x16x1xf32>
    %85 = tpu.reciprocal %84 {approx = true} : vector<2x16x1xf32> -> vector<2x16x1xf32>
    %86 = vector.broadcast %85 : vector<2x16x1xf32> to vector<2x16x16xf32>
    %87 = arith.mulf %82, %86 : vector<2x16x16xf32>
    %88 = arith.truncf %87 : vector<2x16x16xf32> to vector<2x16x16xbf16>
    "tpu.trace_start"() <{level = 10 : i32, message = "bnm,bmd->bnd"}> : () -> ()
    %cst_28 = arith.constant dense<0.000000e+00> : vector<2x16x32xf32>
    %89 = tpu.matmul %88, %76, %cst_28 {dimension_numbers = #tpu.dot_dimension_numbers<[2], [1], [1], [2], [0, 0, 0, 1, 1, 2], [0], [0]>} : vector<2x16x16xbf16>, vector<2x16x32xbf16>, vector<2x16x32xf32> -> vector<2x16x32xf32>
    "tpu.trace_stop"() : () -> ()
    %90 = vector.shape_cast %89 : vector<2x16x32xf32> to vector<32x32xf32>
    %91 = vector.extract_strided_slice %42 {offsets = [0, 64], sizes = [32, 32], strides = [1, 1]} : vector<32x128xf32> to vector<32x32xf32>
    %92 = vector.shape_cast %91 : vector<32x32xf32> to vector<2x16x32xf32>
    %93 = arith.truncf %92 : vector<2x16x32xf32> to vector<2x16x32xbf16>
    %94 = vector.extract_strided_slice %43 {offsets = [0, 64], sizes = [32, 32], strides = [1, 1]} : vector<32x128xf32> to vector<32x32xf32>
    %95 = vector.shape_cast %94 : vector<32x32xf32> to vector<2x16x32xf32>
    %96 = arith.truncf %95 : vector<2x16x32xf32> to vector<2x16x32xbf16>
    %97 = vector.extract_strided_slice %44 {offsets = [0, 64], sizes = [32, 32], strides = [1, 1]} : vector<32x128xf32> to vector<32x32xf32>
    %98 = vector.shape_cast %97 : vector<32x32xf32> to vector<2x16x32xf32>
    %99 = arith.truncf %98 : vector<2x16x32xf32> to vector<2x16x32xbf16>
    "tpu.trace_start"() <{level = 10 : i32, message = "bnd,bmd->bnm"}> : () -> ()
    %cst_29 = arith.constant dense<0.000000e+00> : vector<2x16x16xf32>
    %100 = tpu.matmul %93, %96, %cst_29 {dimension_numbers = #tpu.dot_dimension_numbers<[2], [2], [1], [1], [0, 0, 0, 1, 1, 1], [0], [0]>} : vector<2x16x32xbf16>, vector<2x16x32xbf16>, vector<2x16x16xf32> -> vector<2x16x16xf32>
    "tpu.trace_stop"() : () -> ()
    %cst_30 = arith.constant dense<0xFF800000> : vector<2x16xf32>
    %101 = vector.multi_reduction <maximumf>, %100, %cst_30 [2] : vector<2x16x16xf32> to vector<2x16xf32>
    %102 = vector.shape_cast %101 : vector<2x16xf32> to vector<2x16x1xf32>
    %103 = vector.broadcast %102 : vector<2x16x1xf32> to vector<2x16x16xf32>
    %104 = arith.subf %100, %103 : vector<2x16x16xf32>
    %105 = math.exp %104 : vector<2x16x16xf32>
    %cst_31 = arith.constant dense<0.000000e+00> : vector<2x16xf32>
    %106 = vector.multi_reduction <add>, %105, %cst_31 [2] : vector<2x16x16xf32> to vector<2x16xf32>
    %107 = vector.shape_cast %106 : vector<2x16xf32> to vector<2x16x1xf32>
    %108 = tpu.reciprocal %107 {approx = true} : vector<2x16x1xf32> -> vector<2x16x1xf32>
    %109 = vector.broadcast %108 : vector<2x16x1xf32> to vector<2x16x16xf32>
    %110 = arith.mulf %105, %109 : vector<2x16x16xf32>
    %111 = arith.truncf %110 : vector<2x16x16xf32> to vector<2x16x16xbf16>
    "tpu.trace_start"() <{level = 10 : i32, message = "bnm,bmd->bnd"}> : () -> ()
    %cst_32 = arith.constant dense<0.000000e+00> : vector<2x16x32xf32>
    %112 = tpu.matmul %111, %99, %cst_32 {dimension_numbers = #tpu.dot_dimension_numbers<[2], [1], [1], [2], [0, 0, 0, 1, 1, 2], [0], [0]>} : vector<2x16x16xbf16>, vector<2x16x32xbf16>, vector<2x16x32xf32> -> vector<2x16x32xf32>
    "tpu.trace_stop"() : () -> ()
    %113 = vector.shape_cast %112 : vector<2x16x32xf32> to vector<32x32xf32>
    %114 = vector.extract_strided_slice %42 {offsets = [0, 96], sizes = [32, 32], strides = [1, 1]} : vector<32x128xf32> to vector<32x32xf32>
    %115 = vector.shape_cast %114 : vector<32x32xf32> to vector<2x16x32xf32>
    %116 = arith.truncf %115 : vector<2x16x32xf32> to vector<2x16x32xbf16>
    %117 = vector.extract_strided_slice %43 {offsets = [0, 96], sizes = [32, 32], strides = [1, 1]} : vector<32x128xf32> to vector<32x32xf32>
    %118 = vector.shape_cast %117 : vector<32x32xf32> to vector<2x16x32xf32>
    %119 = arith.truncf %118 : vector<2x16x32xf32> to vector<2x16x32xbf16>
    %120 = vector.extract_strided_slice %44 {offsets = [0, 96], sizes = [32, 32], strides = [1, 1]} : vector<32x128xf32> to vector<32x32xf32>
    %121 = vector.shape_cast %120 : vector<32x32xf32> to vector<2x16x32xf32>
    %122 = arith.truncf %121 : vector<2x16x32xf32> to vector<2x16x32xbf16>
    "tpu.trace_start"() <{level = 10 : i32, message = "bnd,bmd->bnm"}> : () -> ()
    %cst_33 = arith.constant dense<0.000000e+00> : vector<2x16x16xf32>
    %123 = tpu.matmul %116, %119, %cst_33 {dimension_numbers = #tpu.dot_dimension_numbers<[2], [2], [1], [1], [0, 0, 0, 1, 1, 1], [0], [0]>} : vector<2x16x32xbf16>, vector<2x16x32xbf16>, vector<2x16x16xf32> -> vector<2x16x16xf32>
    "tpu.trace_stop"() : () -> ()
    %cst_34 = arith.constant dense<0xFF800000> : vector<2x16xf32>
    %124 = vector.multi_reduction <maximumf>, %123, %cst_34 [2] : vector<2x16x16xf32> to vector<2x16xf32>
    %125 = vector.shape_cast %124 : vector<2x16xf32> to vector<2x16x1xf32>
    %126 = vector.broadcast %125 : vector<2x16x1xf32> to vector<2x16x16xf32>
    %127 = arith.subf %123, %126 : vector<2x16x16xf32>
    %128 = math.exp %127 : vector<2x16x16xf32>
    %cst_35 = arith.constant dense<0.000000e+00> : vector<2x16xf32>
    %129 = vector.multi_reduction <add>, %128, %cst_35 [2] : vector<2x16x16xf32> to vector<2x16xf32>
    %130 = vector.shape_cast %129 : vector<2x16xf32> to vector<2x16x1xf32>
    %131 = tpu.reciprocal %130 {approx = true} : vector<2x16x1xf32> -> vector<2x16x1xf32>
    %132 = vector.broadcast %131 : vector<2x16x1xf32> to vector<2x16x16xf32>
    %133 = arith.mulf %128, %132 : vector<2x16x16xf32>
    %134 = arith.truncf %133 : vector<2x16x16xf32> to vector<2x16x16xbf16>
    "tpu.trace_start"() <{level = 10 : i32, message = "bnm,bmd->bnd"}> : () -> ()
    %cst_36 = arith.constant dense<0.000000e+00> : vector<2x16x32xf32>
    %135 = tpu.matmul %134, %122, %cst_36 {dimension_numbers = #tpu.dot_dimension_numbers<[2], [1], [1], [2], [0, 0, 0, 1, 1, 2], [0], [0]>} : vector<2x16x16xbf16>, vector<2x16x32xbf16>, vector<2x16x32xf32> -> vector<2x16x32xf32>
    "tpu.trace_stop"() : () -> ()
    %136 = vector.shape_cast %135 : vector<2x16x32xf32> to vector<32x32xf32>
    %137 = tpu.concatenate %67, %90, %113, %136 in 1 : vector<32x32xf32>, vector<32x32xf32>, vector<32x32xf32>, vector<32x32xf32> -> vector<32x128xf32>
    %c0_37 = arith.constant 0 : index
    %c0_38 = arith.constant 0 : index
    %c0_39 = arith.constant 0 : index
    %138 = vector.load %arg6[%c0_37, %c0_38, %c0_39] : memref<1x128x128xbf16, #tpu.memory_space<vmem>>, vector<1x128x128xbf16>
    %139 = vector.shape_cast %138 : vector<1x128x128xbf16> to vector<128x128xbf16>
    %c0_40 = arith.constant 0 : index
    %c0_41 = arith.constant 0 : index
    %c0_42 = arith.constant 0 : index
    %140 = vector.load %arg7[%c0_40, %c0_41, %c0_42] : memref<1x1x128xf32, #tpu.memory_space<vmem>>, vector<1x1x128xf32>
    %141 = vector.shape_cast %140 : vector<1x1x128xf32> to vector<128xf32>
    %142 = arith.truncf %137 : vector<32x128xf32> to vector<32x128xbf16>
    %cst_43 = arith.constant dense<0.000000e+00> : vector<32x128xf32>
    %143 = tpu.matmul %142, %139, %cst_43 {dimension_numbers = #tpu.dot_dimension_numbers<[1], [0], [0], [1], [0, 0, 1, 1], [], []>} : vector<32x128xbf16>, vector<128x128xbf16>, vector<32x128xf32> -> vector<32x128xf32>
    %144 = vector.shape_cast %141 : vector<128xf32> to vector<1x128xf32>
    %145 = vector.broadcast %144 : vector<1x128xf32> to vector<32x128xf32>
    %146 = arith.addf %143, %145 : vector<32x128xf32>
    %147 = arith.addf %4, %146 : vector<32x128xf32>
    %c0_44 = arith.constant 0 : index
    %c0_45 = arith.constant 0 : index
    %c0_46 = arith.constant 0 : index
    %148 = vector.load %arg8[%c0_44, %c0_45, %c0_46] : memref<1x1x128xf32, #tpu.memory_space<vmem>>, vector<1x1x128xf32>
    %149 = vector.shape_cast %148 : vector<1x1x128xf32> to vector<128xf32>
    %c0_47 = arith.constant 0 : index
    %c0_48 = arith.constant 0 : index
    %c0_49 = arith.constant 0 : index
    %150 = vector.load %arg9[%c0_47, %c0_48, %c0_49] : memref<1x1x128xf32, #tpu.memory_space<vmem>>, vector<1x1x128xf32>
    %151 = vector.shape_cast %150 : vector<1x1x128xf32> to vector<128xf32>
    %cst_50 = arith.constant dense<0.000000e+00> : vector<32xf32>
    %152 = vector.multi_reduction <add>, %147, %cst_50 [1] : vector<32x128xf32> to vector<32xf32>
    %153 = vector.shape_cast %152 : vector<32xf32> to vector<32x1xf32>
    %cst_51 = arith.constant 1.280000e+02 : f32
    %154 = vector.broadcast %cst_51 : f32 to vector<32x1xf32>
    %155 = arith.divf %153, %154 : vector<32x1xf32>
    %156 = vector.broadcast %155 : vector<32x1xf32> to vector<32x128xf32>
    %157 = arith.subf %147, %156 : vector<32x128xf32>
    %158 = arith.mulf %157, %157 : vector<32x128xf32>
    %cst_52 = arith.constant dense<0.000000e+00> : vector<32xf32>
    %159 = vector.multi_reduction <add>, %158, %cst_52 [1] : vector<32x128xf32> to vector<32xf32>
    %160 = vector.shape_cast %159 : vector<32xf32> to vector<32x1xf32>
    %cst_53 = arith.constant 1.280000e+02 : f32
    %161 = vector.broadcast %cst_53 : f32 to vector<32x1xf32>
    %162 = arith.divf %160, %161 : vector<32x1xf32>
    %cst_54 = arith.constant 9.99999997E-7 : f32
    %163 = vector.broadcast %cst_54 : f32 to vector<32x1xf32>
    %164 = arith.addf %162, %163 : vector<32x1xf32>
    %165 = math.rsqrt %164 : vector<32x1xf32>
    %166 = vector.broadcast %165 : vector<32x1xf32> to vector<32x128xf32>
    %167 = arith.mulf %157, %166 : vector<32x128xf32>
    %168 = vector.shape_cast %149 : vector<128xf32> to vector<1x128xf32>
    %169 = vector.broadcast %168 : vector<1x128xf32> to vector<32x128xf32>
    %170 = arith.mulf %167, %169 : vector<32x128xf32>
    %171 = vector.shape_cast %151 : vector<128xf32> to vector<1x128xf32>
    %172 = vector.broadcast %171 : vector<1x128xf32> to vector<32x128xf32>
    %173 = arith.addf %170, %172 : vector<32x128xf32>
    %c0_55 = arith.constant 0 : index
    %c0_56 = arith.constant 0 : index
    %c0_57 = arith.constant 0 : index
    %174 = vector.load %arg10[%c0_55, %c0_56, %c0_57] : memref<1x128x512xbf16, #tpu.memory_space<vmem>>, vector<1x128x512xbf16>
    %175 = vector.shape_cast %174 : vector<1x128x512xbf16> to vector<128x512xbf16>
    %c0_58 = arith.constant 0 : index
    %c0_59 = arith.constant 0 : index
    %c0_60 = arith.constant 0 : index
    %176 = vector.load %arg11[%c0_58, %c0_59, %c0_60] : memref<1x1x512xf32, #tpu.memory_space<vmem>>, vector<1x1x512xf32>
    %177 = vector.shape_cast %176 : vector<1x1x512xf32> to vector<512xf32>
    %178 = arith.truncf %173 : vector<32x128xf32> to vector<32x128xbf16>
    %cst_61 = arith.constant dense<0.000000e+00> : vector<32x512xf32>
    %179 = tpu.matmul %178, %175, %cst_61 {dimension_numbers = #tpu.dot_dimension_numbers<[1], [0], [0], [1], [0, 0, 1, 1], [], []>} : vector<32x128xbf16>, vector<128x512xbf16>, vector<32x512xf32> -> vector<32x512xf32>
    %180 = vector.shape_cast %177 : vector<512xf32> to vector<1x512xf32>
    %181 = vector.broadcast %180 : vector<1x512xf32> to vector<32x512xf32>
    %182 = arith.addf %179, %181 : vector<32x512xf32>
    %cst_62 = arith.constant 5.000000e-01 : f32
    %183 = vector.broadcast %cst_62 : f32 to vector<32x512xf32>
    %184 = arith.mulf %183, %182 : vector<32x512xf32>
    %cst_63 = arith.constant 0.707106769 : f32
    %185 = vector.broadcast %cst_63 : f32 to vector<32x512xf32>
    %186 = arith.mulf %182, %185 : vector<32x512xf32>
    %187 = math.erf %186 : vector<32x512xf32>
    %cst_64 = arith.constant 1.000000e+00 : f32
    %188 = vector.broadcast %cst_64 : f32 to vector<32x512xf32>
    %189 = arith.addf %188, %187 : vector<32x512xf32>
    %190 = arith.mulf %184, %189 : vector<32x512xf32>
    %c0_65 = arith.constant 0 : index
    %c0_66 = arith.constant 0 : index
    %c0_67 = arith.constant 0 : index
    %191 = vector.load %arg12[%c0_65, %c0_66, %c0_67] : memref<1x512x128xbf16, #tpu.memory_space<vmem>>, vector<1x512x128xbf16>
    %192 = vector.shape_cast %191 : vector<1x512x128xbf16> to vector<512x128xbf16>
    %c0_68 = arith.constant 0 : index
    %c0_69 = arith.constant 0 : index
    %c0_70 = arith.constant 0 : index
    %193 = vector.load %arg13[%c0_68, %c0_69, %c0_70] : memref<1x1x128xf32, #tpu.memory_space<vmem>>, vector<1x1x128xf32>
    %194 = vector.shape_cast %193 : vector<1x1x128xf32> to vector<128xf32>
    %195 = arith.truncf %190 : vector<32x512xf32> to vector<32x512xbf16>
    %cst_71 = arith.constant dense<0.000000e+00> : vector<32x128xf32>
    %196 = tpu.matmul %195, %192, %cst_71 {dimension_numbers = #tpu.dot_dimension_numbers<[1], [0], [0], [1], [0, 0, 1, 1], [], []>} : vector<32x512xbf16>, vector<512x128xbf16>, vector<32x128xf32> -> vector<32x128xf32>
    %197 = vector.shape_cast %194 : vector<128xf32> to vector<1x128xf32>
    %198 = vector.broadcast %197 : vector<1x128xf32> to vector<32x128xf32>
    %199 = arith.addf %196, %198 : vector<32x128xf32>
    %200 = arith.addf %147, %199 : vector<32x128xf32>
    %201 = vector.shape_cast %200 : vector<32x128xf32> to vector<2x16x128xf32>
    %c0_72 = arith.constant 0 : index
    %c0_73 = arith.constant 0 : index
    %c0_74 = arith.constant 0 : index
    %202 = vector.load %arg14[%c0_72, %c0_73, %c0_74] : memref<2x16x128xf32, #tpu.memory_space<vmem>>, vector<2x16x128xf32>
    tpu.vector_store %arg14[%c0_72, %c0_73, %c0_74], %201 {strides = array<i32>} : memref<2x16x128xf32, #tpu.memory_space<vmem>>, vector<2x16x128xf32>,
    return
  }
  func.func @transform_0(%arg0: i32) -> (i32, i32, i32) {
    %c0_i32 = arith.constant 0 : i32
    %c0_i32_0 = arith.constant 0 : i32
    %c0_i32_1 = arith.constant 0 : i32
    %c0_i32_2 = arith.constant 0 : i32
    return %c0_i32, %c0_i32_0, %c0_i32_1 : i32, i32, i32
  }
  func.func @transform_1(%arg0: i32) -> (i32, i32, i32) {
    %c0_i32 = arith.constant 0 : i32
    %c0_i32_0 = arith.constant 0 : i32
    %c0_i32_1 = arith.constant 0 : i32
    return %arg0, %c0_i32, %c0_i32_0 : i32, i32, i32
  }
  func.func @transform_2(%arg0: i32) -> (i32, i32, i32) {
    %c0_i32 = arith.constant 0 : i32
    %c0_i32_0 = arith.constant 0 : i32
    %c0_i32_1 = arith.constant 0 : i32
    return %arg0, %c0_i32, %c0_i32_0 : i32, i32, i32
  }
  func.func @transform_3(%arg0: i32) -> (i32, i32, i32) {
    %c0_i32 = arith.constant 0 : i32
    %c0_i32_0 = arith.constant 0 : i32
    %c0_i32_1 = arith.constant 0 : i32
    return %arg0, %c0_i32, %c0_i32_0 : i32, i32, i32
  }
  func.func @transform_4(%arg0: i32) -> (i32, i32, i32) {
    %c0_i32 = arith.constant 0 : i32
    %c0_i32_0 = arith.constant 0 : i32
    %c0_i32_1 = arith.constant 0 : i32
    return %arg0, %c0_i32, %c0_i32_0 : i32, i32, i32
  }
  func.func @transform_5(%arg0: i32) -> (i32, i32, i32) {
    %c0_i32 = arith.constant 0 : i32
    %c0_i32_0 = arith.constant 0 : i32
    %c0_i32_1 = arith.constant 0 : i32
    return %arg0, %c0_i32, %c0_i32_0 : i32, i32, i32
  }
  func.func @transform_6(%arg0: i32) -> (i32, i32, i32) {
    %c0_i32 = arith.constant 0 : i32
    %c0_i32_0 = arith.constant 0 : i32
    %c0_i32_1 = arith.constant 0 : i32
    return %arg0, %c0_i32, %c0_i32_0 : i32, i32, i32
  }
  func.func @transform_7(%arg0: i32) -> (i32, i32, i32) {
    %c0_i32 = arith.constant 0 : i32
    %c0_i32_0 = arith.constant 0 : i32
    %c0_i32_1 = arith.constant 0 : i32
    return %arg0, %c0_i32, %c0_i32_0 : i32, i32, i32
  }
  func.func @transform_8(%arg0: i32) -> (i32, i32, i32) {
    %c0_i32 = arith.constant 0 : i32
    %c0_i32_0 = arith.constant 0 : i32
    %c0_i32_1 = arith.constant 0 : i32
    return %arg0, %c0_i32, %c0_i32_0 : i32, i32, i32
  }
  func.func @transform_9(%arg0: i32) -> (i32, i32, i32) {
    %c0_i32 = arith.constant 0 : i32
    %c0_i32_0 = arith.constant 0 : i32
    %c0_i32_1 = arith.constant 0 : i32
    return %arg0, %c0_i32, %c0_i32_0 : i32, i32, i32
  }
  func.func @transform_10(%arg0: i32) -> (i32, i32, i32) {
    %c0_i32 = arith.constant 0 : i32
    %c0_i32_0 = arith.constant 0 : i32
    %c0_i32_1 = arith.constant 0 : i32
    return %arg0, %c0_i32, %c0_i32_0 : i32, i32, i32
  }
  func.func @transform_11(%arg0: i32) -> (i32, i32, i32) {
    %c0_i32 = arith.constant 0 : i32
    %c0_i32_0 = arith.constant 0 : i32
    %c0_i32_1 = arith.constant 0 : i32
    return %arg0, %c0_i32, %c0_i32_0 : i32, i32, i32
  }
  func.func @transform_12(%arg0: i32) -> (i32, i32, i32) {
    %c0_i32 = arith.constant 0 : i32
    %c0_i32_0 = arith.constant 0 : i32
    %c0_i32_1 = arith.constant 0 : i32
    return %arg0, %c0_i32, %c0_i32_0 : i32, i32, i32
  }
  func.func @transform_13(%arg0: i32) -> (i32, i32, i32) {
    %c0_i32 = arith.constant 0 : i32
    %c0_i32_0 = arith.constant 0 : i32
    %c0_i32_1 = arith.constant 0 : i32
    %c0_i32_2 = arith.constant 0 : i32
    return %c0_i32, %c0_i32_0, %c0_i32_1 : i32, i32, i32
  }
}

</mosaic_0001>

<bundles_post_ra>
// kernel: tpu_custom_call.1
= control target key start
LH: loop header
LB: loop body
LE: loop exit
PB: predicated region body
PF: predicated region fallthrough
CT: control target
= control target key end

     0   :  { %s5334_s0 = inlined_call_operand.hbm [shape: f32[2,16,128], index: 0, kind: input, shape index: {}]   ;;  %s5335_s1 = inlined_call_operand.hbm [shape: f32[2,1,128], index: 1, kind: input, shape index: {}]   ;;  %s5336_s2 = inlined_call_operand.hbm [shape: f32[2,1,128], index: 2, kind: input, shape index: {}]   ;;  %s5337_s3 = inlined_call_operand.hbm [shape: bf16[2,128,384], index: 3, kind: input, shape index: {}]   ;;  %s5338_s4 = inlined_call_operand.vmem [shape: f32[2,1,384], index: 4, kind: input, shape index: {}]   ;;  %s5339_s5 = inlined_call_operand.hbm [shape: bf16[2,128,128], index: 5, kind: input, shape index: {}]   ;;  %s5340_s6 = inlined_call_operand.vmem [shape: f32[2,1,128], index: 6, kind: input, shape index: {}]   ;;  %s5341_s7 = inlined_call_operand.vmem [shape: f32[2,1,128], index: 7, kind: input, shape index: {}]   ;;  %s5342_s8 = inlined_call_operand.vmem [shape: f32[2,1,128], index: 8, kind: input, shape index: {}]   ;;  %s5343_s9 = inlined_call_operand.hbm [shape: bf16[2,128,512], index: 9, kind: input, shape index: {}]   ;;  %s5344_s10 = inlined_call_operand.vmem [shape: f32[2,1,512], index: 10, kind: input, shape index: {}]   ;;  %s5345_s11 = inlined_call_operand.hbm [shape: bf16[2,512,128], index: 11, kind: input, shape index: {}]   ;;  %s5346_s12 = inlined_call_operand.vmem [shape: f32[2,1,128], index: 12, kind: input, shape index: {}]   ;;  %s5347_s13 = inlined_call_operand.hbm [shape: f32[2,16,128], index: 13, kind: output, shape index: {}]  }
   0x1   :  { %5362 = sst [smem:[#allocation23_spill]] %s5334_s0 }
   0x2   :  { %5363 = sst [smem:[#allocation24_spill]] %s5335_s1 }
   0x3   :  { %5364 = sst [smem:[#allocation25_spill]] %s5336_s2 }
   0x4   :  { %5365 = sst [smem:[#allocation26_spill]] %s5337_s3 }
   0x5   :  { %5366 = sst [smem:[#allocation27_spill]] %s5338_s4 }
   0x6   :  { %5367 = sst [smem:[#allocation28_spill]] %s5339_s5 }
   0x7   :  { %5368 = sst [smem:[#allocation29_spill]] %s5342_s8 }
   0x8   :  { %5369 = sst [smem:[#allocation30_spill]] %s5343_s9 }
   0x9   :  { %5370 = sst [smem:[#allocation31_spill]] %s5344_s10 }
   0xa   :  { %5371 = sst [smem:[#allocation32_spill]] %s5346_s12 }
   0xb   :  { %5372 = sst [smem:[#allocation33_spill]] %s5347_s13 }
   0xc   :  { %18 = vsyncpa [#allocation3], 0 }
   0xd   :  { %19 = vsyncpa [#allocation6], 0 }
   0xe   :  { %21 = vsyncpa [#allocation6 + $0x1], 0 }
   0xf   :  { %22 = vsyncpa [#allocation9], 0 }
  0x10   :  { %24 = vsyncpa [#allocation9 + $0x1], 0 }
  0x11   :  { %25 = vsyncpa [#allocation12], 0 }
  0x12   :  { %27 = vsyncpa [#allocation12 + $0x1], 0 }
  0x13   :  { %28 = vsyncpa [#allocation4], 0  ;;  %s4472_s25 = smov 0   ;;  %s4474_s26 = smov 0  }
  0x14   :  { %s4476_s27 = smov 0   ;;  %s4478_s28 = smov 0  }
  0x15 LB: > { %5373 = sst [smem:[#allocation20_spill]] %s4372_s27  ;;  %s4493_s29 = sadd.s32 1, %s4376_s28   ;;  %s4376_s28 = sphi %s4478_s28, %s5409_s28   ;;  %s4372_s27 = sphi %s4476_s27, %s5411_s27   ;;  %s4368_s26 = sphi %s4474_s26, %s5413_s26   ;;  %s4364_s25 = sphi %s4472_s25, %s5412_s25  }
  0x16   : > { %5374 = sst [smem:[#allocation21_spill]] %s4493_s29  ;;  %s62_s30 = sadd.s32 1, %s4372_s27 }
  0x17   : > { %s59_s14 = ssub.s32 %s4376_s28, %s4493_s29  ;;  %p69_p0 = scmp.ne.s32.totalorder %s4372_s27, %s4368_s26 }
  0x18   : > { %p60_p1 = scmp.eq.s32.totalorder %s59_s14, 0  ;;  %p70_p2 = scmp.eq.s32.totalorder %s4376_s28, 0 }
  0x19   : > { %p3772_p3 = scmp.lt.s32.totalorder %s4376_s28, 2  ;;  %s4506_s16 = sand.u32 1, %s4376_s28  }
  0x1a   : > { %s4503_s15 = scalar_select %p60_p1, %s4372_s27, %s62_s30  }
  0x1b   : > { %p71_p4 = por %p70_p2, %p69_p0  ;;  %s4509_s17 = sand.u32 1, %s4372_s27  }
  0x1c   : > { %5375 = sst [smem:[#allocation22_spill]] %s4503_s15  ;;  %s3336_s18 = sshll.u32 %s4376_s28, 4 }
  0x1d   : > { %s5376_s1 = sld [smem:[#allocation24_spill]]  ;;  %s422_s22 = scalar_lea.vmem [#allocation5], %s4509_s17 }
  0x1e   : > { %s429_s23 = sshll.u32 %s422_s22, 4  ;;  %p4520_p5 = pnand %p3772_p3, %p71_p4  ;;  %s4518_s23 = int_to_ptr.vmem [resolvable:$true] %s429_s23 }
  0x1f   : > { %s5378_s2 = sld [smem:[#allocation25_spill]]  ;;  %s5352_s19 = scalar_lea.sflag [#allocation6], %s4506_s16 }
  0x20   : > { %s5377_s24 = scalar_select %p4520_p5, 1, 0 }
  0x21   : > { %p4534_p7 = pneg %p4520_p5 }
  0x23   : > { %s4515_s21 = scalar_lea.hbm %s5376_s1, %s3336_s18  ;;  %s4097_s13 = scalar_lea.hbm %s5376_s1, 32 }
  0x24   : > { %s4092_s20 = scalar_lea.hbm %s4515_s21, 16  ;;  %p4098_p10 = scmp.lt.u32.totalorder %s4515_s21, %s5376_s1 }
  0x25   : > { %s4527_s15 = scalar_lea.hbm %s5378_s2, %s3336_s18  ;;  %p4093_p6 = scmp.ne.s32.totalorder %s4515_s21, %s4092_s20 }
  0x26   : > { %s5379_s27 = scalar_select %p4534_p7, 1, 0 }
  0x27   : > { %p4095_p8 = pnand %p4534_p7, %p4093_p6  ;;  %p4099_p11 = scmp.lt.u32.totalorder %s4097_s13, %s4092_s20 }
  0x28   : > { %p4101_p13 = scmp.lt.u32.totalorder %s4092_s20, %s4515_s21 }
  0x29   : > { %p4096_p9 = pneg %p4095_p8  ;;  %p4100_p12 = por %p4099_p11, %p4098_p10 }
  0x2b   : > { %p4102_p0 = por %p4101_p13, %p4100_p12 }
  0x2d   : > { %p4103_p1 = pnand %p4102_p0, %p4096_p9 }
  0x2f   : > { %4106 = shalt.err (!%p4103_p1)
}
  0x30   : > { %s4107_s18 = scalar_lea.vmem %s4518_s23, 16  ;;  %s4378_s29 = smov [#allocation5]  }
  0x31   : > { %p4108_p2 = scmp.ne.s32.totalorder %s4518_s23, %s4107_s18  ;;  %s4112_s22 = sshll.u32 %s4378_s29, 4  ;;  %s4113_s22 = int_to_ptr.vmem [resolvable:$false] %s4112_s22 }
  0x32   : > { %s4114_s30 = scalar_lea.vmem %s4113_s22, 32  ;;  %p4115_p6 = scmp.lt.s32.totalorder %s4518_s23, %s4113_s22 }
  0x33   : > { %p4110_p3 = pnand %p4108_p2, %p4534_p7  ;;  %p4116_p8 = scmp.lt.s32.totalorder %s4114_s30, %s4107_s18 }
  0x35   : > { %p4111_p4 = pneg %p4110_p3  ;;  %p4117_p10 = por %p4116_p8, %p4115_p6 }
  0x37   : > { %p4118_p11 = pnand %p4117_p10, %p4111_p4 }
  0x39   : > { %4121 = shalt.err (!%p4118_p11)
}
  0x3a   : > { %3755 = dma.hbm_to_vmem [thread:$0]  (!%p4520_p5), %s4515_s21, 16, %s4518_s23, %s5352_s19  }
  0x3b   : > { %s3724_s13 = smul.u32 192, %s4509_s17  ;;  %s3342_s14 = sshll.u32 %s4509_s17, 8 }
  0x3c   : > { %s3725_s20 = smul.u32 3072, %s4376_s28  ;;  %s5380_s3 = sld [smem:[#allocation26_spill]] }
  0x3d   : > { %s457_s30 = scalar_lea.vmem [#allocation8], %s3724_s13  ;;  %s5354_s12 = scalar_lea.sflag [#allocation9], %s4506_s16 }
  0x3e   : > { %s464_s1 = sshll.u32 %s457_s30, 4  ;;  %s4567_s1 = int_to_ptr.vmem [resolvable:$true] %s464_s1 }
  0x42   : > { %s4565_s22 = scalar_lea.hbm %s5380_s3, %s3725_s20  ;;  %s4127_s29 = scalar_lea.hbm %s5380_s3, 6144 }
  0x43   : > { %s4122_s10 = scalar_lea.hbm %s4565_s22, 3072  ;;  %p4128_p0 = scmp.lt.u32.totalorder %s4565_s22, %s5380_s3 }
  0x44   : > { %p4123_p9 = scmp.ne.s32.totalorder %s4565_s22, %s4122_s10  ;;  %p4129_p1 = scmp.lt.u32.totalorder %s4127_s29, %s4122_s10 }
  0x45   : > { %p4131_p3 = scmp.lt.u32.totalorder %s4122_s10, %s4565_s22 }
  0x46   : > { %p4125_p12 = pnand %p4123_p9, %p4534_p7  ;;  %p4130_p2 = por %p4129_p1, %p4128_p0 }
  0x48   : > { %p4126_p13 = pneg %p4125_p12  ;;  %p4132_p4 = por %p4131_p3, %p4130_p2 }
  0x4a   : > { %p4133_p6 = pnand %p4132_p4, %p4126_p13 }
  0x4c   : > { %4136 = shalt.err (!%p4133_p6)
}
  0x4d   : > { %s4137_s13 = scalar_lea.vmem %s4567_s1, 3072  ;;  %s4379_s30 = smov [#allocation8]  }
  0x4e   : > { %p4138_p8 = scmp.ne.s32.totalorder %s4567_s1, %s4137_s13  ;;  %s4142_s21 = sshll.u32 %s4379_s30, 4  ;;  %s4143_s21 = int_to_ptr.vmem [resolvable:$false] %s4142_s21 }
  0x4f   : > { %s4144_s23 = scalar_lea.vmem %s4143_s21, 6144  ;;  %p4145_p9 = scmp.lt.s32.totalorder %s4567_s1, %s4143_s21 }
  0x50   : > { %p4140_p10 = pnand %p4138_p8, %p4534_p7  ;;  %p4146_p12 = scmp.lt.s32.totalorder %s4144_s23, %s4137_s13 }
  0x52   : > { %p4141_p11 = pneg %p4140_p10  ;;  %p4147_p0 = por %p4146_p12, %p4145_p9 }
  0x54   : > { %p4148_p1 = pnand %p4147_p0, %p4141_p11 }
  0x56   : > { %4151 = shalt.err (!%p4148_p1)
}
  0x57   : > { %s4380_s10 = smov 192   ;;  %s4381_s29 = smov 12  }
  0x58   : > { %3761 = dma.hbm_to_vmem [thread:$0]  (!%p4520_p5), %s4565_s22, 3072, %s4567_s1, %s5354_s12, %s4380_s10, %s4380_s10, %s4381_s29  }
  0x59   : > { %s3478_s20 = sshll.u32 %s4376_s28, 12  ;;  %s524_s18 = scalar_lea.vmem [#allocation11], %s3342_s14 }
  0x5a   : > { %s531_s13 = sshll.u32 %s524_s18, 4  ;;  %s5381_s9 = sld [smem:[#allocation30_spill]]  ;;  %s4603_s13 = int_to_ptr.vmem [resolvable:$true] %s531_s13 }
  0x5b   : > { %s5353_s19 = scalar_lea.sflag [#allocation12], %s4506_s16 }
  0x60   : > { %s4601_s23 = scalar_lea.hbm %s5381_s9, %s3478_s20  ;;  %s4157_s10 = scalar_lea.hbm %s5381_s9, 8192 }
  0x61   : > { %s4152_s3 = scalar_lea.hbm %s4601_s23, 4096  ;;  %p4158_p4 = scmp.lt.u32.totalorder %s4601_s23, %s5381_s9 }
  0x62   : > { %p4153_p13 = scmp.ne.s32.totalorder %s4601_s23, %s4152_s3  ;;  %p4159_p6 = scmp.lt.u32.totalorder %s4157_s10, %s4152_s3 }
  0x63   : > { %p4161_p10 = scmp.lt.u32.totalorder %s4152_s3, %s4601_s23 }
  0x64   : > { %p4155_p2 = pnand %p4153_p13, %p4534_p7  ;;  %p4160_p8 = por %p4159_p6, %p4158_p4 }
  0x66   : > { %p4156_p3 = pneg %p4155_p2  ;;  %p4162_p11 = por %p4161_p10, %p4160_p8 }
  0x68   : > { %p4163_p9 = pnand %p4162_p11, %p4156_p3 }
  0x6a   : > { %4166 = shalt.err (!%p4163_p9)
}
  0x6b   : > { %s4167_s30 = scalar_lea.vmem %s4603_s13, 4096  ;;  %s4382_s21 = smov [#allocation11]  }
  0x6c   : > { %p4168_p12 = scmp.ne.s32.totalorder %s4603_s13, %s4167_s30  ;;  %s4172_s1 = sshll.u32 %s4382_s21, 4  ;;  %s4173_s1 = int_to_ptr.vmem [resolvable:$false] %s4172_s1 }
  0x6d   : > { %s4174_s22 = scalar_lea.vmem %s4173_s1, 8192  ;;  %p4175_p13 = scmp.lt.s32.totalorder %s4603_s13, %s4173_s1 }
  0x6e   : > { %p4170_p0 = pnand %p4168_p12, %p4534_p7  ;;  %p4176_p2 = scmp.lt.s32.totalorder %s4174_s22, %s4167_s30 }
  0x70   : > { %p4171_p1 = pneg %p4170_p0  ;;  %p4177_p4 = por %p4176_p2, %p4175_p13 }
  0x72   : > { %p4178_p6 = pnand %p4177_p4, %p4171_p1 }
  0x74   : > { %4181 = shalt.err (!%p4178_p6)
}
  0x75   : > { %s4383_s3 = smov 256   ;;  %s4384_s10 = smov 16  }
  0x76   : > { %3767 = dma.hbm_to_vmem [thread:$0]  (!%p4520_p5), %s4601_s23, 4096, %s4603_s13, %s5353_s19, %s4383_s3, %s4383_s3, %s4384_s10  }
  0x77   : > { %s4634_s30 = scalar_lea.hbm %s5345_s11, %s3478_s20  ;;  %s552_s21 = scalar_lea.vmem [#allocation13], %s3342_s14 }
  0x78   : > { %s559_s1 = sshll.u32 %s552_s21, 4  ;;  %s4641_s22 = sadd.s32 4294967295, %s4376_s28   ;;  %s4638_s1 = int_to_ptr.vmem [resolvable:$true] %s559_s1 }
  0x79   : > { %p75_p3 = scmp.ne.s32.totalorder %s4368_s26, %s4364_s25  ;;  %p5355_p8 = scmp.eq.s32.totalorder %s4641_s22, 0 }
  0x7a   : > { %p3333_p10 = scmp.ge.s32.totalorder %s4376_s28, 1  ;;  %p393_p11 = scmp.lt.s32.totalorder %s4376_s28, 3 }
  0x7b   : > { %p4651_p12 = por %p5355_p8, %p75_p3  ;;  %s4385_s13 = smov [#allocation2]  }
  0x7c   : > { %p4655_p0 = pnand %p3333_p10, %p393_p11  ;;  %s405_s23 = sshll.u32 %s4385_s13, 4  ;;  %s4659_s23 = int_to_ptr.vmem [resolvable:$true] %s405_s23 }
  0x7d   : > { %s5382_s20 = scalar_select %p4651_p12, 1, 0 }
  0x7e   : > { %s5383_s14 = scalar_select %p4655_p0, 1, 0 }
  0x7f   : > { %p3748_p1 = pneg %p4655_p0  ;;  %s439_s10 = scalar_lea.vmem [#allocation7], %s4509_s17 }
  0x80   : > { %s446_s29 = sshll.u32 %s439_s10, 4  ;;  %s5385_s0 = sld [smem:[#allocation23_spill]]  ;;  %s4671_s29 = int_to_ptr.vmem [resolvable:$true] %s446_s29 }
  0x81   : > { %p4666_p13 = pnand %p3748_p1, %p5355_p8 }
  0x83   : > { %p4184_p4 = pneg %p4666_p13 }
  0x86   : > { %s4182_s13 = scalar_lea.hbm %s5385_s0, 512 }
  0x87   : > { %p4183_p2 = scmp.ne.s32.totalorder %s5385_s0, %s4182_s13  ;;  %p4189_p10 = scmp.lt.u32.totalorder %s4182_s13, %s5385_s0 }
  0x89   : > { %p4185_p6 = pnand %p4184_p4, %p4183_p2 }
  0x8b   : > { %p4186_p3 = pneg %p4185_p6 }
  0x8d   : > { %p4191_p11 = pnand %p4189_p10, %p4186_p3 }
  0x8f   : > { %4194 = shalt.err (!%p4191_p11)
}
  0x90   : > { %s4195_s10 = scalar_lea.vmem %s4659_s23, 512  ;;  %p4203_p12 = scmp.lt.s32.totalorder %s4659_s23, %s4659_s23 }
  0x91   : > { %p4196_p1 = scmp.ne.s32.totalorder %s4659_s23, %s4195_s10  ;;  %p4204_p0 = scmp.lt.s32.totalorder %s4195_s10, %s4195_s10 }
  0x93   : > { %p4198_p9 = pnand %p4196_p1, %p4184_p4  ;;  %p4205_p5 = por %p4204_p0, %p4203_p12 }
  0x95   : > { %p4199_p8 = pneg %p4198_p9 }
  0x97   : > { %p4206_p7 = pnand %p4205_p5, %p4199_p8 }
  0x99   : > { %4209 = shalt.err (!%p4206_p7)
}
  0x9a   : > { %s4386_s9 = smov 128   ;;  %s4387_s4 = smov 8  }
  0x9b   : > { %3751 = dma.hbm_to_vmem [thread:$0]  (!%p4666_p13), %s5385_s0, 512, %s4659_s23, [#allocation3], %s4386_s9, %s4386_s9, %s4387_s4  }
  0x9c   : > { %s4210_s25 = scalar_lea.hbm %s4527_s15, 16  ;;  %p5386_p2 = scmp.ne.s32.totalorder %s5379_s27, 0 }
  0x9d   : > { %p4211_p9 = scmp.ne.s32.totalorder %s4527_s15, %s4210_s25  ;;  %s4215_s10 = scalar_lea.hbm %s5378_s2, 32 }
  0x9e   : > { %p4216_p7 = scmp.lt.u32.totalorder %s4527_s15, %s5378_s2  ;;  %p4217_p8 = scmp.lt.u32.totalorder %s4215_s10, %s4210_s25 }
  0x9f   : > { %p4213_p12 = pnand %p4211_p9, %p5386_p2  ;;  %p4219_p4 = scmp.lt.u32.totalorder %s4210_s25, %s4527_s15 }
  0xa0   : > { %p4218_p0 = por %p4217_p8, %p4216_p7 }
  0xa1   : > { %p4214_p5 = pneg %p4213_p12 }
  0xa2   : > { %p4220_p6 = por %p4219_p4, %p4218_p0 }
  0xa4   : > { %p4221_p3 = pnand %p4220_p6, %p4214_p5 }
  0xa6   : > { %4224 = shalt.err (!%p4221_p3)
}
  0xa7   : > { %s4225_s23 = scalar_lea.vmem %s4671_s29, 16  ;;  %s4388_s3 = smov [#allocation7]  }
  0xa8   : > { %p4226_p13 = scmp.ne.s32.totalorder %s4671_s29, %s4225_s23  ;;  %s4230_s9 = sshll.u32 %s4388_s3, 4  ;;  %s4231_s9 = int_to_ptr.vmem [resolvable:$false] %s4230_s9 }
  0xa9   : > { %s4232_s8 = scalar_lea.vmem %s4231_s9, 32  ;;  %p4233_p1 = scmp.lt.s32.totalorder %s4671_s29, %s4231_s9 }
  0xaa   : > { %p4228_p10 = pnand %p4226_p13, %p5386_p2  ;;  %p4234_p9 = scmp.lt.s32.totalorder %s4232_s8, %s4225_s23 }
  0xac   : > { %p4229_p11 = pneg %p4228_p10  ;;  %p4235_p12 = por %p4234_p9, %p4233_p1 }
  0xae   : > { %p4236_p7 = pnand %p4235_p12, %p4229_p11 }
  0xb0   : > { %4239 = shalt.err (!%p4236_p7)
}
  0xb1   : > { %p5387_p5 = scmp.ne.s32.totalorder %s5377_s24, 0  ;;  %s5388_s18 = scalar_lea.sflag [#allocation6], %s4506_s16 }
  0xb2   : > { %s5389_s4 = sshll.u32 %s4376_s28, 10  ;;  %s5390_s5 = sld [smem:[#allocation28_spill]] }
  0xb3   : > { %3758 = dma.hbm_to_vmem [thread:$0]  (!%p5387_p5), %s4527_s15, 16, %s4671_s29, %s5388_s18  }
  0xb4   : > { %s5391_s21 = sshll.u32 %s4509_s17, 6 }
  0xb5   : > { %s485_s13 = scalar_lea.vmem [#allocation10], %s5391_s21 }
  0xb6   : > { %s492_s10 = sshll.u32 %s485_s13, 4  ;;  %s4727_s10 = int_to_ptr.vmem [resolvable:$true] %s492_s10 }
  0xb8   : > { %s4723_s25 = scalar_lea.hbm %s5390_s5, %s5389_s4  ;;  %s4245_s29 = scalar_lea.hbm %s5390_s5, 2048 }
  0xb9   : > { %s4240_s23 = scalar_lea.hbm %s4723_s25, 1024  ;;  %p4246_p6 = scmp.lt.u32.totalorder %s4723_s25, %s5390_s5 }
  0xba   : > { %p4241_p8 = scmp.ne.s32.totalorder %s4723_s25, %s4240_s23  ;;  %p4247_p3 = scmp.lt.u32.totalorder %s4245_s29, %s4240_s23 }
  0xbb   : > { %p4249_p10 = scmp.lt.u32.totalorder %s4240_s23, %s4723_s25 }
  0xbc   : > { %p4243_p0 = pnand %p4241_p8, %p5386_p2  ;;  %p4248_p13 = por %p4247_p3, %p4246_p6 }
  0xbe   : > { %p4244_p4 = pneg %p4243_p0  ;;  %p4250_p11 = por %p4249_p10, %p4248_p13 }
  0xc0   : > { %p4251_p1 = pnand %p4250_p11, %p4244_p4 }
  0xc2   : > { %4254 = shalt.err (!%p4251_p1)
}
  0xc3   : > { %s4255_s17 = scalar_lea.vmem %s4727_s10, 1024  ;;  %s4389_s8 = smov [#allocation10]  }
  0xc4   : > { %p4256_p9 = scmp.ne.s32.totalorder %s4727_s10, %s4255_s17  ;;  %s4260_s18 = sshll.u32 %s4389_s8, 4  ;;  %s4261_s18 = int_to_ptr.vmem [resolvable:$false] %s4260_s18 }
  0xc5   : > { %s4262_s4 = scalar_lea.vmem %s4261_s18, 2048  ;;  %p4263_p8 = scmp.lt.s32.totalorder %s4727_s10, %s4261_s18 }
  0xc6   : > { %p4258_p12 = pnand %p4256_p9, %p5386_p2  ;;  %p4264_p0 = scmp.lt.s32.totalorder %s4262_s4, %s4255_s17 }
  0xc8   : > { %p4259_p7 = pneg %p4258_p12  ;;  %p4265_p6 = por %p4264_p0, %p4263_p8 }
  0xca   : > { %p4266_p3 = pnand %p4265_p6, %p4259_p7 }
  0xcc   : > { %4269 = shalt.err (!%p4266_p3)
}
  0xcd   : > { %s4390_s12 = smov 64   ;;  %s4391_s19 = smov 4  }
  0xce   : > { %s5392_s21 = scalar_lea.sflag [#allocation9], %s4506_s16  ;;  %s4270_s13 = scalar_lea.hbm %s4634_s30, 4096 }
  0xcf   : > { %3764 = dma.hbm_to_vmem [thread:$0]  (!%p5387_p5), %s4723_s25, 1024, %s4727_s10, %s5392_s21, %s4390_s12, %s4390_s12, %s4391_s19  }
  0xd0   : > { %p4271_p4 = scmp.ne.s32.totalorder %s4634_s30, %s4270_s13  ;;  %s4275_s15 = scalar_lea.hbm %s5345_s11, 8192 }
  0xd1   : > { %p4276_p11 = scmp.lt.u32.totalorder %s4634_s30, %s5345_s11  ;;  %p4277_p1 = scmp.lt.u32.totalorder %s4275_s15, %s4270_s13 }
  0xd2   : > { %p4273_p13 = pnand %p4271_p4, %p5386_p2  ;;  %p4279_p12 = scmp.lt.u32.totalorder %s4270_s13, %s4634_s30 }
  0xd3   : > { %p4278_p9 = por %p4277_p1, %p4276_p11 }
  0xd4   : > { %p4274_p10 = pneg %p4273_p13 }
  0xd5   : > { %p4280_p7 = por %p4279_p12, %p4278_p9 }
  0xd7   : > { %p4281_p8 = pnand %p4280_p7, %p4274_p10 }
  0xd9   : > { %4284 = shalt.err (!%p4281_p8)
}
  0xda   : > { %s4285_s25 = scalar_lea.vmem %s4638_s1, 4096  ;;  %s4392_s10 = smov [#allocation13]  }
  0xdb   : > { %p4286_p0 = scmp.ne.s32.totalorder %s4638_s1, %s4285_s25  ;;  %s4290_s9 = sshll.u32 %s4392_s10, 4  ;;  %s4291_s9 = int_to_ptr.vmem [resolvable:$false] %s4290_s9 }
  0xdc   : > { %s4292_s17 = scalar_lea.vmem %s4291_s9, 8192  ;;  %p4293_p4 = scmp.lt.s32.totalorder %s4638_s1, %s4291_s9 }
  0xdd   : > { %p4288_p6 = pnand %p4286_p0, %p5386_p2  ;;  %p4294_p13 = scmp.lt.s32.totalorder %s4292_s17, %s4285_s25 }
  0xdf   : > { %p4289_p3 = pneg %p4288_p6  ;;  %p4295_p11 = por %p4294_p13, %p4293_p4 }
  0xe1   : > { %p4296_p1 = pnand %p4295_p11, %p4289_p3 }
  0xe3   : > { %4299 = shalt.err (!%p4296_p1)
}
  0xe4   : > { %s5393_s8 = scalar_lea.sflag [#allocation12], %s4506_s16  ;;  %p5394_p2 = scmp.ne.s32.totalorder %s5383_s14, 0 }
  0xe5   : > { %3770 = dma.hbm_to_vmem [thread:$0]  (!%p5387_p5), %s4634_s30, 4096, %s4638_s1, %s5393_s8, %s4390_s12, %s4390_s12, %s4391_s19  }
  0xe6   : > { %577 = sbr.rel (%p5394_p2) target bundleno = 4422 (0x1146), region = 72  ;;  %p5395_p10 = scmp.eq.s32.totalorder (!%p5394_p2), %s4641_s22, 0 }
  0xed   : > { %4343 = dma.done.wait (%p5395_p10), [#allocation3], 512   ;;  %p5396_p9 = pmov %p5395_p10 }
  0xee   : > { %s583_s27 = sand.u32 1, %s4641_s22   ;;  %s4789_s24 = sand.u32 1, %s4368_s26  }
  0xef   : > { %4345 = vsyncadd (%p5396_p9), [#allocation3], 4294966784  ;;  %s584_s16 = scalar_lea.sflag [#allocation6], %s583_s27  ;;  %p5397_p12 = scmp.ne.s32.totalorder %s5382_s20, 0 }
  0xf1   : > { %4347 = dma.done.wait (%p5397_p12), %s584_s16, 32  }
  0xf2   : > { %4349 = vsyncadd (%p5397_p12), %s584_s16, 4294967264  ;;  %s3726_s30 = smul.u32 192, %s4789_s24  ;;  %s600_s14 = scalar_lea.sflag [#allocation9], %s583_s27 }
  0xf4   : > { %s4798_s4 = scalar_lea.vmem [#allocation8], %s3726_s30 }
  0xf5   : > { %4351 = dma.done.wait (%p5397_p12), %s600_s14, 4096  }
  0xf6   : > { %4353 = vsyncadd (%p5397_p12), %s600_s14, 4294963200  ;;  %s3350_s12 = sshll.u32 %s4789_s24, 6  ;;  %s3351_s19 = sshll.u32 %s4789_s24, 8 }
  0xf7   : > { %s4806_s21 = scalar_lea.vmem [#allocation10], %s3350_s12  ;;  %s618_s13 = scalar_lea.sflag [#allocation12], %s583_s27 }
  0xf8   : > { %s4808_s23 = scalar_lea.vmem [#allocation11], %s3351_s19 }
  0xf9   : > { %4355 = dma.done.wait (%p5397_p12), %s618_s13, 8192  }
  0xfa   : > { %4357 = vsyncadd (%p5397_p12), %s618_s13, 4294959104  ;;  %p711_p5 = scmp.lt.s32.totalorder %s4641_s22, 1  ;;  %s5398_s27 = sld [smem:[#allocation29_spill]] }
  0xfb   : > { %s5399_s12 = sld [smem:[#allocation27_spill]]  ;;  %s5400_s2 = sld [smem:[#allocation31_spill]] }
  0xfc   : > { %s4816_s28 = scalar_select %p711_p5, %s4641_s22, 1 }
  0xfd   : > { %s5401_s25 = sld [smem:[#allocation32_spill]]  ;;  %s4846_s9 = scalar_lea.vmem [#allocation13], %s3351_s19 }
  0xfe   : > { %s3727_s15 = smul.u32 3, %s4816_s28  ;;  %s720_s20 = scalar_lea.vmem %s5341_s7, %s4816_s28 }
  0xff   : > { %s3353_s1 = sshll.u32 %s4816_s28, 2  ;;  %p5402_p7 = scmp.ne.s32.totalorder %s4641_s22, 0 }
 0x100   : > { %s723_s16 = scalar_lea.vmem %s5398_s27, %s4816_s28  ;;  %v736_v0 = vld [vmem:[#allocation2] sm:$0xff] (!%p5402_p7)  ;;  %v737_v1 = vld [vmem:[#allocation2 + $0x8] sm:$0xff] (!%p5402_p7)  ;;  %v738_v2 = vld [vmem:[#allocation2 + $0x10] sm:$0xff] (!%p5402_p7) }
 0x101   : > { %s4834_s13 = scalar_lea.vmem %s5399_s12, %s3727_s15  ;;  %s4840_s5 = scalar_lea.vmem %s5400_s2, %s3353_s1  ;;  %740 = vst [vmem:[#allocation14] sm:$0xff] (!%p5402_p7), %v736_v0  ;;  %741 = vst [vmem:[#allocation14 + $0x8] sm:$0xff] (!%p5402_p7), %v737_v1  ;;  %v739_v3 = vld [vmem:[#allocation2 + $0x18] sm:$0xff] (!%p5402_p7) }
 0x102   : > { %735 = sbr.rel (%p5402_p7) target bundleno = 265 (0x109), region = 104  ;;  %742 = vst [vmem:[#allocation14 + $0x10] sm:$0xff] (!%p5402_p7), %v738_v2  ;;  %743 = vst [vmem:[#allocation14 + $0x18] sm:$0xff] (!%p5402_p7), %v739_v3 }
 0x103   : > { %s730_s10 = scalar_lea.vmem %s5401_s25, %s4816_s28 }
 0x109 PF: > { %v744_v4 = vld [vmem:[#allocation14] sm:$0xff]  ;;  %v746_v5 = vld [vmem:[#allocation14 + $0x10] sm:$0xff]  ;;  %v745_v6 = vld [vmem:[#allocation14 + $0x8] sm:$0xff]  ;;  %v4393_v43 = vmov 0   ;;  %s5403_s0 = scalar_lea.vmem [#allocation5], %s4789_s24  ;;  %s5404_s2 = scalar_lea.vmem [#allocation7], %s4789_s24 }
 0x10a   : > { %750 = vadd.xlane.f32.xlu0 %v744_v4  ;;  %754 = vadd.xlane.f32.xlu1 %v746_v5  ;;  %v747_v7 = vld [vmem:[#allocation14 + $0x18] sm:$0xff]  ;;  %v3856_v8 = vld [vmem:[%s4798_s4 + $0x4] ss:$12 sps:$4 sm:$0xff]   ;;  %v3858_v9 = vld [vmem:[%s4798_s4] ss:$12 sps:$4 sm:$0xff]   ;;  %vm4395_vm0 = vmmov 0  }
 0x10b   : > { %v3859_v10 = vld [vmem:[%s4798_s4 + $0x1c] ss:$12 sps:$4 sm:$0xff]   ;;  %994 = vmatprep.subr.bf16.mxu0 %v3856_v8  ;;  %v3862_v28 = vld [vmem:[%s4798_s4 + $0x18] ss:$12 sps:$4 sm:$0xff]   ;;  %v3863_v29 = vld [vmem:[%s4798_s4 + $0x34] ss:$12 sps:$4 sm:$0xff]   ;;  %1026 = vmatprep.mubr.bf16.mxu0 %v4393_v43 }
 0x10c   : > { %v3861_v11 = vld [vmem:[%s4798_s4 + $0x8] ss:$12 sps:$4 sm:$0xff]   ;;  %995 = vmatpush1.bf16.msra.mxu0 %v3858_v9  ;;  %v3865_v30 = vld [vmem:[%s4798_s4 + $0x20] ss:$12 sps:$4 sm:$0xff]   ;;  %v3866_v31 = vld [vmem:[%s4798_s4 + $0x30] ss:$12 sps:$4 sm:$0xff]  }
 0x10d   : > { %3588 = vmatprep.subr.bf16.mxu1 %v3861_v11  ;;  %996 = vmatprep.subr.bf16.mxu0 %v3859_v10  ;;  %v3867_v32 = vld [vmem:[%s4798_s4 + $0x4c] ss:$12 sps:$4 sm:$0xff]   ;;  %v3870_v34 = vld [vmem:[%s4798_s4 + $0x48] ss:$12 sps:$4 sm:$0xff]   ;;  %v3871_v35 = vld [vmem:[%s4798_s4 + $0x64] ss:$12 sps:$4 sm:$0xff]  }
 0x10e   : > { %752 = vadd.xlane.f32.xlu0 %v745_v6  ;;  %756 = vadd.xlane.f32.xlu1 %v747_v7  ;;  %v3869_v33 = vld [vmem:[%s4798_s4 + $0x38] ss:$12 sps:$4 sm:$0xff]   ;;  %v3873_v36 = vld [vmem:[%s4798_s4 + $0x50] ss:$12 sps:$4 sm:$0xff]   ;;  %v3874_v37 = vld [vmem:[%s4798_s4 + $0x60] ss:$12 sps:$4 sm:$0xff]  }
 0x10f   : > { %3589 = vmatpush3.bf16.msra.mxu1 %v3861_v11  ;;  %v3875_v38 = vld [vmem:[%s4798_s4 + $0x7c] ss:$12 sps:$4 sm:$0xff]   ;;  %v3878_v40 = vld [vmem:[%s4798_s4 + $0x78] ss:$12 sps:$4 sm:$0xff]   ;;  %v3879_v41 = vld [vmem:[%s4798_s4 + $0x94] ss:$12 sps:$4 sm:$0xff]  }
 0x110   : > { %997 = vmatpush1.bf16.msra.mxu0 %v3862_v28  ;;  %3590 = vmatprep.subr.bf16.mxu1 %v3865_v30  ;;  %v3877_v39 = vld [vmem:[%s4798_s4 + $0x68] ss:$12 sps:$4 sm:$0xff]   ;;  %v3881_v42 = vld [vmem:[%s4798_s4 + $0x80] ss:$12 sps:$4 sm:$0xff]   ;;  %v3882_v44 = vld [vmem:[%s4798_s4 + $0x90] ss:$12 sps:$4 sm:$0xff]  }
 0x111   : > { %998 = vmatprep.subr.bf16.mxu0 %v3863_v29  ;;  %v3883_v45 = vld [vmem:[%s4798_s4 + $0xac] ss:$12 sps:$4 sm:$0xff]   ;;  %v3886_v47 = vld [vmem:[%s4798_s4 + $0xa8] ss:$12 sps:$4 sm:$0xff]   ;;  %v3887_v48 = vld [vmem:[%s4798_s4 + $0xb0] ss:$12 sps:$4 sm:$0xff]  }
 0x112   : > { %v3885_v46 = vld [vmem:[%s4798_s4 + $0x98] ss:$12 sps:$4 sm:$0xff]   ;;  %v3355_v63 = vld [vmem:[%s5403_s0] ss:$0 sm:$0xff]  ;;  %vm1106_vm1 = vcmask 261120   ;;  %vm1201_vm2 = vcmask 130048  }
 0x113   : > { %3591 = vmatpush3.bf16.msra.mxu1 %v3865_v30  ;;  %s4396_s24 = smov 96   ;;  %s4397_s18 = smov 64   ;;  %vm2120_vm3 = vcmask 523264   ;;  %vm2125_vm4 = vcmask 785408  }
 0x114   : > { %999 = vmatpush1.bf16.msra.mxu0 %v3866_v31  ;;  %3592 = vmatprep.subr.bf16.mxu1 %v3869_v33  ;;  %s4398_s1 = smov 32   ;;  %p3774_p8 = scmp.eq.s32.totalorder %s4641_s22, 1 }
 0x115   : > { %1000 = vmatprep.subr.bf16.mxu0 %v3867_v32 }
 0x117   : > { %3593 = vmatpush3.bf16.msra.mxu1 %v3869_v33 }
 0x118   : > { %1001 = vmatpush1.bf16.msra.mxu0 %v3870_v34  ;;  %3594 = vmatprep.subr.bf16.mxu1 %v3873_v36 }
 0x119   : > { %1002 = vmatprep.subr.bf16.mxu0 %v3871_v35 }
 0x11b   : > { %3595 = vmatpush3.bf16.msra.mxu1 %v3873_v36 }
 0x11c   : > { %1003 = vmatpush1.bf16.msra.mxu0 %v3874_v37  ;;  %3596 = vmatprep.subr.bf16.mxu1 %v3877_v39 }
 0x11d   : > { %1004 = vmatprep.subr.bf16.mxu0 %v3875_v38 }
 0x11f   : > { %3597 = vmatpush3.bf16.msra.mxu1 %v3877_v39 }
 0x120   : > { %1005 = vmatpush1.bf16.msra.mxu0 %v3878_v40  ;;  %3598 = vmatprep.subr.bf16.mxu1 %v3881_v42 }
 0x121   : > { %1006 = vmatprep.subr.bf16.mxu0 %v3879_v41 }
 0x123   : > { %3599 = vmatpush3.bf16.msra.mxu1 %v3881_v42 }
 0x124   : > { %1007 = vmatpush1.bf16.msra.mxu0 %v3882_v44  ;;  %3600 = vmatprep.subr.bf16.mxu1 %v3885_v46 }
 0x125   : > { %1008 = vmatprep.subr.bf16.mxu0 %v3883_v45 }
 0x127   : > { %3601 = vmatpush3.bf16.msra.mxu1 %v3885_v46 }
 0x128   : > { %1009 = vmatpush1.bf16.msra.mxu0 %v3886_v47  ;;  %3602 = vmatprep.subr.bf16.mxu1 %v3887_v48 }
 0x12b   : > { %3603 = vmatpush3.bf16.msra.mxu1 %v3887_v48 }
 0x197   : > { %v751_v12 = vpop.xlane.xlu0 %750  ;;  %v755_v13 = vpop.xlane.xlu1 %754 }
 0x198   : > { %v759_v14 = vmul.f32 0.0078125, %v751_v12  ;;  %v761_v15 = vmul.f32 0.0078125, %v755_v13 }
 0x19a   : > { %v4854_v16 = vsub.f32 %v744_v4, %v759_v14  ;;  %v4856_v17 = vsub.f32 %v746_v5, %v761_v15  ;;  %v3356_v4 = vld [vmem:[%s5404_s2] ss:$0 sm:$0xff] }
 0x19b   : > { %v753_v18 = vpop.xlane.xlu0 %752  ;;  %v757_v19 = vpop.xlane.xlu1 %756 }
 0x19c   : > { %v760_v20 = vmul.f32 0.0078125, %v753_v18  ;;  %v767_v21 = vmul.f32 %v4854_v16, %v4854_v16  ;;  %v762_v22 = vmul.f32 0.0078125, %v757_v19  ;;  %v769_v25 = vmul.f32 %v4856_v17, %v4856_v17 }
 0x19d   : > { %v851_v18 = vlaneseq }
 0x19e   : > { %v4860_v23 = vsub.f32 %v745_v6, %v760_v20  ;;  %771 = vadd.xlane.f32.xlu0 %v767_v21  ;;  %v4862_v24 = vsub.f32 %v747_v7, %v762_v22  ;;  %v847_v21 = vld [vmem:[%s4834_s13] sm:$0x7] }
 0x19f   : > { %v4906_v19 = vshrl.u32 %v851_v18, 7 }
 0x1a0   : > { %v768_v26 = vmul.f32 %v4860_v23, %v4860_v23  ;;  %v770_v27 = vmul.f32 %v4862_v24, %v4862_v24 }
 0x1a1   : > { %v853_v20 = vsub.s32 0, %v4906_v19  ;;  %v857_v22 = vsub.s32 1, %v4906_v19 }
 0x1a2   : > { %775 = vadd.xlane.f32.xlu0 %v769_v25  ;;  %773 = vadd.xlane.f32.xlu1 %v768_v26 }
 0x1a3   : > { %v858_v26 = vrot.slane %v847_v21, %v857_v22 }
 0x1a6   : > { %777 = vadd.xlane.f32.xlu1 %v770_v27 }
 0x22b   : > { %v772_v49 = vpop.xlane.xlu0 %771 }
 0x22c   : > { %v779_v50 = vmul.f32 0.0078125, %v772_v49 }
 0x22e   : > { %v783_v51 = vadd.f32 1e-06, %v779_v50 }
 0x22f   : > { %v774_v52 = vpop.xlane.xlu1 %773  ;;  %v776_v53 = vpop.xlane.xlu0 %775 }
 0x230   : > { %3976 = vrsqrt.f32 %v783_v51  ;;  %v780_v54 = vmul.f32 0.0078125, %v774_v52  ;;  %v781_v55 = vmul.f32 0.0078125, %v776_v53 }
 0x232   : > { %v784_v56 = vadd.f32 1e-06, %v780_v54  ;;  %v785_v57 = vadd.f32 1e-06, %v781_v55 }
 0x233   : > { %v778_v58 = vpop.xlane.xlu1 %777 }
 0x234   : > { %3978 = vrsqrt.f32 %v784_v56  ;;  %v782_v59 = vmul.f32 0.0078125, %v778_v58 }
 0x235   : > { %3980 = vrsqrt.f32 %v785_v57 }
 0x236   : > { %v786_v60 = vadd.f32 1e-06, %v782_v59 }
 0x238   : > { %3982 = vrsqrt.f32 %v786_v60 }
 0x23a   : > { %v3977_v61 = vpop.eup %3976 }
 0x23b   : > { %v791_v62 = vmul.f32 %v3977_v61, %v4854_v16 }
 0x23d   : > { %v801_v3 = vmul.f32 %v3355_v63, %v791_v62 }
 0x23e   : > { %v3979_v0 = vpop.eup %3978 }
 0x23f   : > { %v3981_v1 = vpop.eup %3980  ;;  %v792_v2 = vmul.f32 %v3979_v0, %v4860_v23  ;;  %v811_v8 = vadd.f32 %v3356_v4, %v801_v3  ;;  %v854_v23 = vrot.slane %v847_v21, %v853_v20 }
 0x240   : > { %v793_v5 = vmul.f32 %v3981_v1, %v4856_v17  ;;  %v4394_v17 = vmov 0.0  }
 0x241   : > { %v802_v6 = vmul.f32 %v3355_v63, %v792_v2  ;;  %3608 = vmatprep.subr.bf16.mxu0 %v4394_v17  ;;  %3620 = vmatprep.subr.bf16.mxu1 %v4394_v17 }
 0x242   : > { %v3983_v7 = vpop.eup %3982  ;;  %v803_v11 = vmul.f32 %v3355_v63, %v793_v5 }
 0x243   : > { %v812_v9 = vadd.f32 %v3356_v4, %v802_v6  ;;  %v794_v10 = vmul.f32 %v3983_v7, %v4862_v24  ;;  %v861_v24 = vsub.s32 2, %v4906_v19 }
 0x244   : > { %v813_v14 = vadd.f32 %v3356_v4, %v803_v11 }
 0x245   : > { %v848_v12 = vpack.c.bf16 %v812_v9, %v811_v8  ;;  %v804_v13 = vmul.f32 %v3355_v63, %v794_v10  ;;  %v862_v32 = vrot.slane %v847_v21, %v861_v24 }
 0x247   : > { %1027 = vmatmul.mubr.bf16.vlgmr.msra.gmra.mrb[0].mxu0 %v848_v12  ;;  %3604 = vmatprep.mubr.bf16.mxu1 %v848_v12  ;;  %v814_v15 = vadd.f32 %v3356_v4, %v804_v13 }
 0x248   : > { %1036 = vmatprep.mubr.bf16.mxu0 %v4393_v43 }
 0x249   : > { %v849_v16 = vpack.c.bf16 %v814_v15, %v813_v14 }
 0x24b   : > { %3605 = vmatmul.mubr.bf16.vlgmr.msra.gmra.mrb[0].mxu1 %v849_v16 }
 0x24c   : > { %3622 = vmatprep.mubr.msk.bf16.mxu1 %vm4395_vm0, %v4394_v17 }
 0x24f   : > { %1037 = vmatmul.mubr.bf16.gmra.mrb[4].mxu0 %v849_v16 }
 0x250   : > { %3610 = vmatprep.mubr.msk.bf16.mxu0 %vm4395_vm0, %v4394_v17 }
 0x31a   : > { %v1028_v25 = vpop.f32.mrb[0].mxu0 }
 0x31b   : > { %v1029_v27 = vadd.f32 %v1028_v25, %v854_v23  ;;  %v1030_v28 = vpop.f32.mrb[1].mxu0 }
 0x31c   : > { %v1032_v29 = vpop.f32.mrb[2].mxu0  ;;  %v1031_v33 = vadd.f32 %v1030_v28, %v858_v26 }
 0x31d   : > { %v1033_v30 = vadd.f32 %v1032_v29, %v854_v23  ;;  %v1034_v31 = vpop.f32.mrb[3].mxu0  ;;  %v1096_v36 = vmul.f32 0.17677669, %v1029_v27 }
 0x31e   : > { %v1035_v34 = vadd.f32 %v1034_v31, %v858_v26  ;;  %v3606_v35 = vpop.f32.mrb[0].mxu1 }
 0x31f   : > { %v1097_v37 = vmul.f32 0.17677669, %v1033_v30  ;;  %v1081_v38 = vpop.f32.mrb[1].mxu1  ;;  %v1090_v42 = vadd.f32 %v3606_v35, %v862_v32 }
 0x320   : > { %v4918_v39 = vpack.c.bf16 %v1035_v34, %v1031_v33  ;;  %v3607_v40 = vpop.f32.mrb[2].mxu1  ;;  %v1082_v46 = vadd.f32 %v1081_v38, %v862_v32 }
 0x321   : > { %v4920_v41 = vpack.c.bf16 %v1097_v37, %v1096_v36  ;;  %v1093_v44 = vadd.f32 %v3607_v40, %v862_v32  ;;  %v1084_v45 = vpop.f32.mrb[3].mxu1 }
 0x322   : > { %v1085_v47 = vadd.f32 %v1084_v45, %v862_v32  ;;  %v1038_v48 = vpop.f32.mrb[4].mxu0  ;;  %v1111_v49 = vsel %vm1106_vm1, %v4918_v39, 0 }
 0x323   : > { %v4924_v50 = vpack.c.bf16 %v1093_v44, %v1090_v42  ;;  %v1039_v51 = vadd.f32 %v1038_v48, %v854_v23  ;;  %v1040_v52 = vpop.f32.mrb[5].mxu0  ;;  %3609 = vmatpush3.bf16.xpose.msra.mxu0 %v1111_v49 }
 0x324   : > { %v4926_v53 = vpack.c.bf16 %v1085_v47, %v1082_v46  ;;  %v1042_v54 = vpop.f32.mrb[6].mxu0  ;;  %3614 = vmatprep.subr.bf16.mxu0 %v4394_v17  ;;  %v1041_v57 = vadd.f32 %v1040_v52, %v858_v26 }
 0x325   : > { %v1043_v55 = vadd.f32 %v1042_v54, %v854_v23  ;;  %v1044_v56 = vpop.f32.mrb[7].mxu0  ;;  %v1098_v59 = vmul.f32 0.17677669, %v1039_v51 }
 0x326   : > { %v1045_v58 = vadd.f32 %v1044_v56, %v858_v26  ;;  %3621 = vmatpush3.bf16.msra.mxu1 %v4926_v53 }
 0x327   : > { %v1099_v60 = vmul.f32 0.17677669, %v1043_v55  ;;  %3632 = vmatprep.subr.bf16.mxu1 %v4394_v17 }
 0x328   : > { %v4931_v61 = vpack.c.bf16 %v1045_v58, %v1041_v57 }
 0x329   : > { %v4933_v62 = vpack.c.bf16 %v1099_v60, %v1098_v59 }
 0x32a   : > { %3611 = vmatmul.mubr.msk.bf16.vlgmr.msra.gmra.mrb[8].mxu0 %vm1106_vm1, %v4920_v41  ;;  %v1158_v63 = vsel %vm1106_vm1, %v4931_v61, 0 }
 0x32b   : > { %3615 = vmatpush3.bf16.xpose.msra.mxu0 %v1158_v63  ;;  %3616 = vmatprep.mubr.msk.bf16.mxu0 %vm4395_vm0, %v4394_v17 }
 0x32c   : > { %3626 = vmatprep.subr.bf16.mxu0 %v4394_v17 }
 0x332   : > { %3617 = vmatmul.mubr.msk.bf16.vlgmr.msra.gmra.mrb[12].mxu0 %vm1106_vm1, %v4933_v62 }
 0x333   : > { %3627 = vmatpush3.bf16.msra.mxu0 %v4924_v50  ;;  %3628 = vmatprep.mubr.msk.bf16.mxu0 %vm4395_vm0, %v4394_v17 }
 0x334   : > { %3638 = vmatprep.subr.bf16.mxu0 %v4394_v17 }
 0x3fd   : > { %v1147_v0 = vpop.f32.mrb[8].mxu0 }
 0x3fe   : > { %v3612_v1 = vpop.f32.mrb[9].mxu0  ;;  %v1202_v2 = vsel %vm1201_vm2, %v1147_v0, -inf }
 0x3ff   : > { %1203 = vmax.xlane.f32.xlu0 %v1202_v2  ;;  %v1150_v3 = vpop.f32.mrb[10].mxu0 }
 0x400   : > { %v3613_v4 = vpop.f32.mrb[11].mxu0  ;;  %v1205_v5 = vsel %vm1201_vm2, %v1150_v3, -inf }
 0x401   : > { %1206 = vmax.xlane.f32.xlu1 %v1205_v5 }
 0x405   : > { %v1194_v6 = vpop.f32.mrb[12].mxu0 }
 0x406   : > { %v3618_v7 = vpop.f32.mrb[13].mxu0  ;;  %v1208_v8 = vsel %vm1201_vm2, %v1194_v6, -inf }
 0x407   : > { %1209 = vmax.xlane.f32.xlu0 %v1208_v8  ;;  %v1197_v9 = vpop.f32.mrb[14].mxu0 }
 0x408   : > { %v3619_v10 = vpop.f32.mrb[15].mxu0  ;;  %v1211_v11 = vsel %vm1201_vm2, %v1197_v9, -inf }
 0x409   : > { %1212 = vmax.xlane.f32.xlu1 %v1211_v11 }
 0x48c   : > { %v1204_v12 = vpop.xlane.xlu0 %1203 }
 0x48d   : > { %v1214_v13 = vsub.f32 %v1147_v0, %v1204_v12 }
 0x48e   : > { %v1207_v14 = vpop.xlane.xlu1 %1206 }
 0x48f   : > { %v1218_v15 = vmul.f32 1.442695, %v1214_v13  ;;  %v1215_v16 = vsub.f32 %v1150_v3, %v1207_v14 }
 0x491   : > { %3984 = vpow2.f32 %v1218_v15  ;;  %v1220_v18 = vmul.f32 1.442695, %v1215_v16 }
 0x493   : > { %3986 = vpow2.f32 %v1220_v18 }
 0x494   : > { %v1210_v21 = vpop.xlane.xlu0 %1209 }
 0x495   : > { %v1216_v23 = vsub.f32 %v1194_v6, %v1210_v21 }
 0x496   : > { %v1213_v32 = vpop.xlane.xlu1 %1212 }
 0x497   : > { %v1222_v25 = vmul.f32 1.442695, %v1216_v23  ;;  %v1217_v33 = vsub.f32 %v1197_v9, %v1213_v32 }
 0x499   : > { %3988 = vpow2.f32 %v1222_v25  ;;  %v1224_v34 = vmul.f32 1.442695, %v1217_v33 }
 0x49b   : > { %v3985_v26 = vpop.eup %3984  ;;  %3990 = vpow2.f32 %v1224_v34 }
 0x49c   : > { %v1226_v27 = vsel %vm1201_vm2, %v3985_v26, 0.0 }
 0x49d   : > { %v3987_v28 = vpop.eup %3986  ;;  %1227 = vadd.xlane.f32.xlu0 %v1226_v27 }
 0x49e   : > { %v1229_v29 = vsel %vm1201_vm2, %v3987_v28, 0.0 }
 0x49f   : > { %1230 = vadd.xlane.f32.xlu1 %v1229_v29 }
 0x4a3   : > { %v3989_v30 = vpop.eup %3988 }
 0x4a4   : > { %v1232_v31 = vsel %vm1201_vm2, %v3989_v30, 0.0 }
 0x4a5   : > { %1233 = vadd.xlane.f32.xlu0 %v1232_v31  ;;  %v3991_v35 = vpop.eup %3990 }
 0x4a6   : > { %v1235_v36 = vsel %vm1201_vm2, %v3991_v35, 0.0 }
 0x4b0   : > { %1393 = vrot.lane.b32.xlu1 %v4931_v61, %s4396_s24 }
 0x4bb   : > { %1340 = vrot.lane.b32.xlu0 %v4918_v39, %s4396_s24 }
 0x4d4   : > { %1236 = vadd.xlane.f32.xlu1 %v1235_v36 }
 0x4e5   : > { %1337 = vrot.lane.b32.xlu1 %v4920_v41, %s4396_s24 }
 0x4e9   : > { %1390 = vrot.lane.b32.xlu1 %v4933_v62, %s4396_s24 }
 0x52a   : > { %v1228_v37 = vpop.xlane.xlu0 %1227 }
 0x52b   : > { %3992 = vrcp.f32 %v1228_v37 }
 0x52c   : > { %v1231_v38 = vpop.xlane.xlu1 %1230 }
 0x52d   : > { %3994 = vrcp.f32 %v1231_v38 }
 0x530   : > { %v1394_v51 = vpop.permute.xlu1 %1393 }
 0x531   : > { %v1399_v60 = vsel %vm1106_vm1, %v1394_v51, 0 }
 0x532   : > { %v1234_v40 = vpop.xlane.xlu0 %1233 }
 0x533   : > { %3996 = vrcp.f32 %v1234_v40 }
 0x535   : > { %v3993_v42 = vpop.eup %3992 }
 0x536   : > { %v1242_v45 = vmul.f32 %v3993_v42, %v3985_v26  ;;  %v1341_v47 = vpop.permute.xlu0 %1340 }
 0x537   : > { %v3995_v44 = vpop.eup %3994  ;;  %v1346_v49 = vsel %vm1106_vm1, %v1341_v47, 0 }
 0x538   : > { %v1243_v46 = vmul.f32 %v3995_v44, %v3987_v28 }
 0x53a   : > { %v1246_v48 = vpack.c.bf16 %v1243_v46, %v1242_v45 }
 0x53c   : > { %3623 = vmatmul.mubr.msk.bf16.vlgmr.msra.gmra.mrb[4].mxu1 %vm1201_vm2, %v1246_v48 }
 0x53d   : > { %3633 = vmatpush3.bf16.xpose.msra.mxu1 %v1346_v49  ;;  %3634 = vmatprep.mubr.msk.bf16.mxu1 %vm4395_vm0, %v4394_v17  ;;  %v3997_v55 = vpop.eup %3996 }
 0x53e   : > { %3644 = vmatprep.subr.bf16.mxu1 %v4394_v17  ;;  %v1244_v57 = vmul.f32 %v3997_v55, %v3989_v30 }
 0x561   : > { %v1237_v52 = vpop.xlane.xlu1 %1236 }
 0x562   : > { %3998 = vrcp.f32 %v1237_v52 }
 0x565   : > { %v1338_v54 = vpop.permute.xlu1 %1337 }
 0x566   : > { %3635 = vmatmul.mubr.msk.bf16.vlgmr.msra.gmra.mrb[8].mxu1 %vm1106_vm1, %v1338_v54 }
 0x567   : > { %3646 = vmatprep.mubr.msk.bf16.mxu1 %vm4395_vm0, %v4394_v17 }
 0x569   : > { %v1391_v63 = vpop.permute.xlu1 %1390 }
 0x56c   : > { %v3999_v56 = vpop.eup %3998 }
 0x56d   : > { %v1245_v58 = vmul.f32 %v3999_v56, %v3991_v35 }
 0x56f   : > { %v1247_v59 = vpack.c.bf16 %v1245_v58, %v1244_v57 }
 0x571   : > { %3629 = vmatmul.mubr.msk.bf16.vlgmr.msra.gmra.mrb[16].mxu0 %vm1201_vm2, %v1247_v59 }
 0x572   : > { %3639 = vmatpush3.bf16.xpose.msra.mxu0 %v1399_v60  ;;  %3640 = vmatprep.mubr.msk.bf16.mxu0 %vm4395_vm0, %v4394_v17 }
 0x573   : > { %3650 = vmatprep.subr.bf16.mxu0 %v4394_v17 }
 0x579   : > { %3641 = vmatmul.mubr.msk.bf16.vlgmr.msra.gmra.mrb[20].mxu0 %vm1106_vm1, %v1391_v63 }
 0x57a   : > { %3652 = vmatprep.mubr.msk.bf16.mxu0 %vm4395_vm0, %v4394_v17 }
 0x60f   : > { %v4980_v0 = vpop.f32.mrb[4].mxu1 }
 0x610   : > { %v3624_v1 = vpop.f32.mrb[5].mxu1 }
 0x611   : > { %v4982_v2 = vpop.f32.mrb[6].mxu1 }
 0x612   : > { %v3625_v3 = vpop.f32.mrb[7].mxu1 }
 0x639   : > { %v1382_v4 = vpop.f32.mrb[8].mxu1 }
 0x63a   : > { %v3636_v5 = vpop.f32.mrb[9].mxu1  ;;  %v1442_v6 = vsel %vm1201_vm2, %v1382_v4, -inf }
 0x63b   : > { %1443 = vmax.xlane.f32.xlu0 %v1442_v6  ;;  %v1385_v7 = vpop.f32.mrb[10].mxu1 }
 0x63c   : > { %v3637_v8 = vpop.f32.mrb[11].mxu1  ;;  %v1445_v9 = vsel %vm1201_vm2, %v1385_v7, -inf }
 0x63d   : > { %1446 = vmax.xlane.f32.xlu1 %v1445_v9 }
 0x644   : > { %v4986_v10 = vpop.f32.mrb[16].mxu0 }
 0x645   : > { %v3630_v11 = vpop.f32.mrb[17].mxu0 }
 0x646   : > { %v4988_v12 = vpop.f32.mrb[18].mxu0 }
 0x647   : > { %v3631_v13 = vpop.f32.mrb[19].mxu0 }
 0x64c   : > { %v1435_v14 = vpop.f32.mrb[20].mxu0 }
 0x64d   : > { %v3642_v15 = vpop.f32.mrb[21].mxu0  ;;  %v1448_v16 = vsel %vm1201_vm2, %v1435_v14, -inf }
 0x64e   : > { %1449 = vmax.xlane.f32.xlu0 %v1448_v16  ;;  %v1438_v18 = vpop.f32.mrb[22].mxu0 }
 0x64f   : > { %v3643_v21 = vpop.f32.mrb[23].mxu0  ;;  %v1451_v23 = vsel %vm1201_vm2, %v1438_v18, -inf }
 0x652   : > { %1452 = vmax.xlane.f32.xlu0 %v1451_v23 }
 0x6c8   : > { %v1444_v25 = vpop.xlane.xlu0 %1443 }
 0x6c9   : > { %v1454_v26 = vsub.f32 %v1382_v4, %v1444_v25 }
 0x6ca   : > { %v1447_v27 = vpop.xlane.xlu1 %1446 }
 0x6cb   : > { %v1458_v28 = vmul.f32 1.442695, %v1454_v26  ;;  %v1455_v29 = vsub.f32 %v1385_v7, %v1447_v27 }
 0x6cd   : > { %4000 = vpow2.f32 %v1458_v28  ;;  %v1460_v30 = vmul.f32 1.442695, %v1455_v29 }
 0x6cf   : > { %4002 = vpow2.f32 %v1460_v30 }
 0x6d7   : > { %v4001_v31 = vpop.eup %4000 }
 0x6d8   : > { %v1466_v32 = vsel %vm1201_vm2, %v4001_v31, 0.0 }
 0x6d9   : > { %v4003_v33 = vpop.eup %4002  ;;  %1467 = vadd.xlane.f32.xlu0 %v1466_v32 }
 0x6da   : > { %v1469_v34 = vsel %vm1201_vm2, %v4003_v33, 0.0 }
 0x6db   : > { %1470 = vadd.xlane.f32.xlu1 %v1469_v34  ;;  %v1450_v35 = vpop.xlane.xlu0 %1449 }
 0x6dc   : > { %v1456_v36 = vsub.f32 %v1435_v14, %v1450_v35 }
 0x6de   : > { %v1462_v37 = vmul.f32 1.442695, %v1456_v36 }
 0x6df   : > { %v1453_v42 = vpop.xlane.xlu0 %1452 }
 0x6e0   : > { %4004 = vpow2.f32 %v1462_v37  ;;  %v1457_v44 = vsub.f32 %v1438_v18, %v1453_v42 }
 0x6e2   : > { %v1464_v45 = vmul.f32 1.442695, %v1457_v44 }
 0x6e4   : > { %4006 = vpow2.f32 %v1464_v45 }
 0x6ea   : > { %v4005_v38 = vpop.eup %4004 }
 0x6eb   : > { %v1472_v40 = vsel %vm1201_vm2, %v4005_v38, 0.0 }
 0x6ec   : > { %1537 = vrot.lane.b32.xlu1 %v4924_v50, %s4396_s24  ;;  %1473 = vadd.xlane.f32.xlu0 %v1472_v40 }
 0x6ee   : > { %v4007_v46 = vpop.eup %4006 }
 0x6ef   : > { %v1475_v47 = vsel %vm1201_vm2, %v4007_v46, 0.0 }
 0x6f0   : > { %1586 = vrot.lane.b32.xlu1 %v4918_v39, %s4397_s18 }
 0x702   : > { %1489 = vrot.lane.b32.xlu0 %v4926_v53, %s4396_s24 }
 0x706   : > { %1584 = vrot.lane.b32.xlu0 %v4920_v41, %s4397_s18 }
 0x714   : > { %1476 = vadd.xlane.f32.xlu1 %v1475_v47 }
 0x725   : > { %1637 = vrot.lane.b32.xlu1 %v4931_v61, %s4397_s18 }
 0x729   : > { %1635 = vrot.lane.b32.xlu1 %v4933_v62, %s4397_s18 }
 0x766   : > { %v1468_v51 = vpop.xlane.xlu0 %1467 }
 0x768   : > { %v1471_v48 = vpop.xlane.xlu1 %1470 }
 0x769   : > { %4008 = vrcp.f32 %v1471_v48 }
 0x76a   : > { %4010 = vrcp.f32 %v1468_v51 }
 0x76c   : > { %v1538_v49 = vpop.permute.xlu1 %1537 }
 0x76d   : > { %3651 = vmatpush3.bf16.msra.mxu0 %v1538_v49 }
 0x76e   : > { %3662 = vmatprep.subr.bf16.mxu0 %v4394_v17 }
 0x770   : > { %v1587_v60 = vpop.permute.xlu1 %1586 }
 0x771   : > { %v1592_v63 = vsel %vm1106_vm1, %v1587_v60, 0 }
 0x773   : > { %v4009_v52 = vpop.eup %4008 }
 0x774   : > { %v4011_v55 = vpop.eup %4010  ;;  %v1483_v56 = vmul.f32 %v4009_v52, %v4003_v33 }
 0x775   : > { %v1482_v57 = vmul.f32 %v4011_v55, %v4001_v31 }
 0x777   : > { %v1486_v59 = vpack.c.bf16 %v1483_v56, %v1482_v57 }
 0x779   : > { %v1474_v54 = vpop.xlane.xlu0 %1473 }
 0x77a   : > { %4012 = vrcp.f32 %v1474_v54 }
 0x77d   : > { %v1490_v58 = vpop.permute.xlu0 %1489 }
 0x77e   : > { %3645 = vmatpush3.bf16.msra.mxu1 %v1490_v58 }
 0x77f   : > { %3656 = vmatprep.subr.bf16.mxu1 %v4394_v17 }
 0x781   : > { %3647 = vmatmul.mubr.msk.bf16.vlgmr.msra.gmra.mrb[12].mxu1 %vm1201_vm2, %v1486_v59  ;;  %v1585_v1 = vpop.permute.xlu0 %1584 }
 0x782   : > { %3658 = vmatprep.mubr.msk.bf16.mxu1 %vm4395_vm0, %v4394_v17 }
 0x784   : > { %v4013_v4 = vpop.eup %4012 }
 0x785   : > { %v1484_v6 = vmul.f32 %v4013_v4, %v4005_v38 }
 0x787   : > { %3657 = vmatpush3.bf16.xpose.msra.mxu1 %v1592_v63 }
 0x788   : > { %3668 = vmatprep.subr.bf16.mxu1 %v4394_v17 }
 0x78e   : > { %3659 = vmatmul.mubr.msk.bf16.vlgmr.msra.gmra.mrb[16].mxu1 %vm1106_vm1, %v1585_v1 }
 0x78f   : > { %3670 = vmatprep.mubr.msk.bf16.mxu1 %vm4395_vm0, %v4394_v17 }
 0x7a1   : > { %v1477_v3 = vpop.xlane.xlu1 %1476 }
 0x7a2   : > { %4014 = vrcp.f32 %v1477_v3 }
 0x7a5   : > { %v1638_v8 = vpop.permute.xlu1 %1637 }
 0x7a6   : > { %v1643_v11 = vsel %vm1106_vm1, %v1638_v8, 0 }
 0x7a9   : > { %v1636_v13 = vpop.permute.xlu1 %1635 }
 0x7ac   : > { %v4015_v5 = vpop.eup %4014 }
 0x7ad   : > { %v1485_v7 = vmul.f32 %v4015_v5, %v4007_v46 }
 0x7af   : > { %v1487_v9 = vpack.c.bf16 %v1485_v7, %v1484_v6 }
 0x7b1   : > { %3653 = vmatmul.mubr.msk.bf16.vlgmr.msra.gmra.mrb[24].mxu0 %vm1201_vm2, %v1487_v9 }
 0x7b2   : > { %3663 = vmatpush3.bf16.xpose.msra.mxu0 %v1643_v11  ;;  %3664 = vmatprep.mubr.msk.bf16.mxu0 %vm4395_vm0, %v4394_v17 }
 0x7b3   : > { %3674 = vmatprep.subr.bf16.mxu0 %v4394_v17 }
 0x7b9   : > { %3665 = vmatmul.mubr.msk.bf16.vlgmr.msra.gmra.mrb[28].mxu0 %vm1106_vm1, %v1636_v13 }
 0x7ba   : > { %3676 = vmatprep.mubr.msk.bf16.mxu0 %vm4395_vm0, %v4394_v17 }
 0x854   : > { %v5026_v14 = vpop.f32.mrb[12].mxu1 }
 0x855   : > { %v3648_v15 = vpop.f32.mrb[13].mxu1 }
 0x856   : > { %v5028_v16 = vpop.f32.mrb[14].mxu1 }
 0x857   : > { %v3826_v18 = vpack.i.bf16 %v5028_v16, %v5026_v14  ;;  %v3649_v21 = vpop.f32.mrb[15].mxu1 }
 0x861   : > { %v1628_v23 = vpop.f32.mrb[16].mxu1 }
 0x862   : > { %v3660_v25 = vpop.f32.mrb[17].mxu1  ;;  %v1686_v26 = vsel %vm1201_vm2, %v1628_v23, -inf }
 0x863   : > { %1687 = vmax.xlane.f32.xlu0 %v1686_v26  ;;  %v1631_v27 = vpop.f32.mrb[18].mxu1 }
 0x864   : > { %v3661_v28 = vpop.f32.mrb[19].mxu1  ;;  %v1689_v29 = vsel %vm1201_vm2, %v1631_v27, -inf }
 0x865   : > { %1690 = vmax.xlane.f32.xlu1 %v1689_v29 }
 0x884   : > { %v5034_v30 = vpop.f32.mrb[24].mxu0 }
 0x885   : > { %v3654_v31 = vpop.f32.mrb[25].mxu0 }
 0x886   : > { %v5036_v32 = vpop.f32.mrb[26].mxu0 }
 0x887   : > { %v3831_v33 = vpack.i.bf16 %v5036_v32, %v5034_v30  ;;  %v3655_v34 = vpop.f32.mrb[27].mxu0 }
 0x88c   : > { %v1679_v35 = vpop.f32.mrb[28].mxu0 }
 0x88d   : > { %v3666_v36 = vpop.f32.mrb[29].mxu0  ;;  %v1692_v37 = vsel %vm1201_vm2, %v1679_v35, -inf }
 0x88e   : > { %1693 = vmax.xlane.f32.xlu0 %v1692_v37  ;;  %v1682_v38 = vpop.f32.mrb[30].mxu0 }
 0x88f   : > { %v3667_v40 = vpop.f32.mrb[31].mxu0  ;;  %v1695_v42 = vsel %vm1201_vm2, %v1682_v38, -inf }
 0x892   : > { %1696 = vmax.xlane.f32.xlu0 %v1695_v42 }
 0x8f0   : > { %v1688_v44 = vpop.xlane.xlu0 %1687 }
 0x8f1   : > { %v1698_v45 = vsub.f32 %v1628_v23, %v1688_v44 }
 0x8f2   : > { %v1691_v46 = vpop.xlane.xlu1 %1690 }
 0x8f3   : > { %v1702_v47 = vmul.f32 1.442695, %v1698_v45  ;;  %v1699_v48 = vsub.f32 %v1631_v27, %v1691_v46 }
 0x8f5   : > { %4016 = vpow2.f32 %v1702_v47  ;;  %v1704_v49 = vmul.f32 1.442695, %v1699_v48 }
 0x8f7   : > { %4018 = vpow2.f32 %v1704_v49 }
 0x8ff   : > { %v4017_v51 = vpop.eup %4016 }
 0x900   : > { %v1710_v52 = vsel %vm1201_vm2, %v4017_v51, 0.0 }
 0x901   : > { %v4019_v54 = vpop.eup %4018  ;;  %1711 = vadd.xlane.f32.xlu0 %v1710_v52 }
 0x902   : > { %v1713_v55 = vsel %vm1201_vm2, %v4019_v54, 0.0 }
 0x903   : > { %1714 = vadd.xlane.f32.xlu1 %v1713_v55 }
 0x914   : > { %1779 = vrot.lane.b32.xlu1 %v4924_v50, %s4397_s18 }
 0x918   : > { %1828 = vrot.lane.b32.xlu1 %v4918_v39, %s4398_s1 }
 0x91b   : > { %v1694_v56 = vpop.xlane.xlu0 %1693 }
 0x91c   : > { %v1700_v57 = vsub.f32 %v1679_v35, %v1694_v56 }
 0x91e   : > { %v1706_v58 = vmul.f32 1.442695, %v1700_v57 }
 0x91f   : > { %v1697_v59 = vpop.xlane.xlu0 %1696 }
 0x920   : > { %4020 = vpow2.f32 %v1706_v58  ;;  %v1701_v60 = vsub.f32 %v1682_v38, %v1697_v59 }
 0x922   : > { %v1708_v1 = vmul.f32 1.442695, %v1701_v60 }
 0x924   : > { %4022 = vpow2.f32 %v1708_v1 }
 0x92a   : > { %v4021_v63 = vpop.eup %4020 }
 0x92b   : > { %v1716_v3 = vsel %vm1201_vm2, %v4021_v63, 0.0 }
 0x92c   : > { %1717 = vadd.xlane.f32.xlu0 %v1716_v3 }
 0x92e   : > { %v4023_v4 = vpop.eup %4022 }
 0x92f   : > { %v1719_v5 = vsel %vm1201_vm2, %v4023_v4, 0.0 }
 0x93c   : > { %1720 = vadd.xlane.f32.xlu1 %v1719_v5 }
 0x942   : > { %1732 = vrot.lane.b32.xlu0 %v4926_v53, %s4397_s18 }
 0x946   : > { %1826 = vrot.lane.b32.xlu0 %v4920_v41, %s4398_s1 }
 0x94d   : > { %1879 = vrot.lane.b32.xlu1 %v4931_v61, %s4398_s1 }
 0x951   : > { %1877 = vrot.lane.b32.xlu1 %v4933_v62, %s4398_s1 }
 0x98e   : > { %v1712_v7 = vpop.xlane.xlu0 %1711 }
 0x990   : > { %v1715_v39 = vpop.xlane.xlu1 %1714 }
 0x991   : > { %4024 = vrcp.f32 %v1715_v39 }
 0x992   : > { %4026 = vrcp.f32 %v1712_v7 }
 0x994   : > { %v1780_v6 = vpop.permute.xlu1 %1779 }
 0x995   : > { %3675 = vmatpush3.bf16.msra.mxu0 %v1780_v6 }
 0x996   : > { %3686 = vmatprep.subr.bf16.mxu0 %v4394_v17 }
 0x998   : > { %v1829_v61 = vpop.permute.xlu1 %1828 }
 0x999   : > { %v1834_v62 = vsel %vm1106_vm1, %v1829_v61, 0 }
 0x99b   : > { %v4025_v8 = vpop.eup %4024 }
 0x99c   : > { %v4027_v11 = vpop.eup %4026  ;;  %v1727_v13 = vmul.f32 %v4025_v8, %v4019_v54 }
 0x99d   : > { %v1726_v15 = vmul.f32 %v4027_v11, %v4017_v51 }
 0x99f   : > { %v1730_v21 = vpack.c.bf16 %v1727_v13, %v1726_v15 }
 0x9b9   : > { %v1718_v9 = vpop.xlane.xlu0 %1717 }
 0x9ba   : > { %4028 = vrcp.f32 %v1718_v9 }
 0x9bd   : > { %v1733_v41 = vpop.permute.xlu0 %1732 }
 0x9be   : > { %3669 = vmatpush3.bf16.msra.mxu1 %v1733_v41 }
 0x9bf   : > { %3680 = vmatprep.subr.bf16.mxu1 %v4394_v17 }
 0x9c1   : > { %3671 = vmatmul.mubr.msk.bf16.vlgmr.msra.gmra.mrb[20].mxu1 %vm1201_vm2, %v1730_v21  ;;  %v1827_v25 = vpop.permute.xlu0 %1826 }
 0x9c2   : > { %3682 = vmatprep.mubr.msk.bf16.mxu1 %vm4395_vm0, %v4394_v17 }
 0x9c4   : > { %v4029_v26 = vpop.eup %4028 }
 0x9c5   : > { %v1728_v28 = vmul.f32 %v4029_v26, %v4021_v63 }
 0x9c7   : > { %3681 = vmatpush3.bf16.xpose.msra.mxu1 %v1834_v62 }
 0x9c8   : > { %3692 = vmatprep.subr.bf16.mxu1 %v4394_v17 }
 0x9c9   : > { %v1721_v23 = vpop.xlane.xlu1 %1720 }
 0x9ca   : > { %4030 = vrcp.f32 %v1721_v23 }
 0x9cd   : > { %v1880_v31 = vpop.permute.xlu1 %1879 }
 0x9ce   : > { %3683 = vmatmul.mubr.msk.bf16.vlgmr.msra.gmra.mrb[24].mxu1 %vm1106_vm1, %v1827_v25  ;;  %v1885_v35 = vsel %vm1106_vm1, %v1880_v31, 0 }
 0x9cf   : > { %3694 = vmatprep.mubr.msk.bf16.mxu1 %vm4395_vm0, %v4394_v17 }
 0x9d1   : > { %v1878_v36 = vpop.permute.xlu1 %1877 }
 0x9d4   : > { %v4031_v27 = vpop.eup %4030 }
 0x9d5   : > { %v1729_v29 = vmul.f32 %v4031_v27, %v4023_v4 }
 0x9d7   : > { %v1731_v34 = vpack.c.bf16 %v1729_v29, %v1728_v28 }
 0x9d9   : > { %3677 = vmatmul.mubr.msk.bf16.vlgmr.msra.gmra.mrb[32].mxu0 %vm1201_vm2, %v1731_v34 }
 0x9da   : > { %3687 = vmatpush3.bf16.xpose.msra.mxu0 %v1885_v35  ;;  %3688 = vmatprep.mubr.msk.bf16.mxu0 %vm4395_vm0, %v4394_v17 }
 0x9db   : > { %3698 = vmatprep.subr.bf16.mxu0 %v4394_v17 }
 0x9e1   : > { %3689 = vmatmul.mubr.msk.bf16.vlgmr.msra.gmra.mrb[36].mxu0 %vm1106_vm1, %v1878_v36 }
 0x9e2   : > { %3700 = vmatprep.mubr.msk.bf16.mxu0 %vm4395_vm0, %v4394_v17 }
 0xa94   : > { %v1772_v37 = vpop.f32.mrb[20].mxu1 }
 0xa95   : > { %v3672_v38 = vpop.f32.mrb[21].mxu1 }
 0xa96   : > { %v1775_v40 = vpop.f32.mrb[22].mxu1 }
 0xa97   : > { %v3836_v42 = vpack.i.bf16 %v1775_v40, %v1772_v37  ;;  %v3673_v44 = vpop.f32.mrb[23].mxu1 }
 0xa98   : > { %v3889_v44 = vld [vmem:[%s4806_s21 + $0x8] sm:$0xff]  }
 0xaa1   : > { %v1870_v45 = vpop.f32.mrb[24].mxu1 }
 0xaa2   : > { %v3684_v46 = vpop.f32.mrb[25].mxu1  ;;  %v1928_v47 = vsel %vm1201_vm2, %v1870_v45, -inf }
 0xaa3   : > { %1929 = vmax.xlane.f32.xlu0 %v1928_v47  ;;  %v1873_v48 = vpop.f32.mrb[26].mxu1  ;;  %v3891_v46 = vld [vmem:[%s4806_s21 + $0x18] sm:$0xff]   ;;  %v3892_v47 = vld [vmem:[%s4806_s21 + $0x20] sm:$0xff]  }
 0xaa4   : > { %v3685_v49 = vpop.f32.mrb[27].mxu1  ;;  %v1931_v51 = vsel %vm1201_vm2, %v1873_v48, -inf }
 0xaa5   : > { %1932 = vmax.xlane.f32.xlu1 %v1931_v51  ;;  %v3894_v49 = vld [vmem:[%s4806_s21 + $0x30] sm:$0xff]  }
 0xaac   : > { %v1819_v52 = vpop.f32.mrb[32].mxu0 }
 0xaad   : > { %v3678_v54 = vpop.f32.mrb[33].mxu0 }
 0xaae   : > { %v1822_v55 = vpop.f32.mrb[34].mxu0 }
 0xaaf   : > { %v3841_v56 = vpack.i.bf16 %v1822_v55, %v1819_v52  ;;  %v3679_v17 = vpop.f32.mrb[35].mxu0 }
 0xab0   : > { %v3895_v17 = vld [vmem:[%s4806_s21 + $0x38] sm:$0xff]  }
 0xab4   : > { %v1921_v57 = vpop.f32.mrb[36].mxu0 }
 0xab5   : > { %v3690_v58 = vpop.f32.mrb[37].mxu0  ;;  %v1934_v59 = vsel %vm1201_vm2, %v1921_v57, -inf }
 0xab6   : > { %1935 = vmax.xlane.f32.xlu0 %v1934_v59  ;;  %v1924_v60 = vpop.f32.mrb[38].mxu0 }
 0xab7   : > { %v3691_v63 = vpop.f32.mrb[39].mxu0  ;;  %v1937_v1 = vsel %vm1201_vm2, %v1924_v60, -inf }
 0xaba   : > { %1938 = vmax.xlane.f32.xlu0 %v1937_v1 }
 0xb30   : > { %v1930_v3 = vpop.xlane.xlu0 %1929 }
 0xb31   : > { %v1940_v4 = vsub.f32 %v1870_v45, %v1930_v3  ;;  %v3890_v45 = vld [vmem:[%s4806_s21 + $0x10] sm:$0xff]  }
 0xb32   : > { %v1933_v5 = vpop.xlane.xlu1 %1932 }
 0xb33   : > { %v1944_v39 = vmul.f32 1.442695, %v1940_v4  ;;  %v1941_v6 = vsub.f32 %v1873_v48, %v1933_v5  ;;  %v3893_v48 = vld [vmem:[%s4806_s21 + $0x28] sm:$0xff]  }
 0xb35   : > { %4032 = vpow2.f32 %v1944_v39  ;;  %v1946_v7 = vmul.f32 1.442695, %v1941_v6 }
 0xb37   : > { %4034 = vpow2.f32 %v1946_v7 }
 0xb3f   : > { %v4033_v8 = vpop.eup %4032 }
 0xb40   : > { %v1952_v9 = vsel %vm1201_vm2, %v4033_v8, 0.0 }
 0xb41   : > { %v4035_v11 = vpop.eup %4034  ;;  %1953 = vadd.xlane.f32.xlu0 %v1952_v9 }
 0xb42   : > { %v1955_v13 = vsel %vm1201_vm2, %v4035_v11, 0.0 }
 0xb43   : > { %1956 = vadd.xlane.f32.xlu1 %v1955_v13  ;;  %v1936_v15 = vpop.xlane.xlu0 %1935 }
 0xb44   : > { %v1942_v41 = vsub.f32 %v1921_v57, %v1936_v15 }
 0xb46   : > { %v1948_v21 = vmul.f32 1.442695, %v1942_v41 }
 0xb47   : > { %v1939_v61 = vpop.xlane.xlu0 %1938 }
 0xb48   : > { %4036 = vpow2.f32 %v1948_v21  ;;  %v1943_v62 = vsub.f32 %v1924_v60, %v1939_v61 }
 0xb4a   : > { %v1950_v23 = vmul.f32 1.442695, %v1943_v62 }
 0xb4c   : > { %4038 = vpow2.f32 %v1950_v23 }
 0xb52   : > { %v4037_v25 = vpop.eup %4036 }
 0xb53   : > { %v1958_v26 = vsel %vm1201_vm2, %v4037_v25, 0.0 }
 0xb54   : > { %1959 = vadd.xlane.f32.xlu0 %v1958_v26 }
 0xb56   : > { %v4039_v27 = vpop.eup %4038 }
 0xb57   : > { %v1961_v28 = vsel %vm1201_vm2, %v4039_v27, 0.0 }
 0xb58   : > { %1962 = vadd.xlane.f32.xlu1 %v1961_v28 }
 0xb69   : > { %2021 = vrot.lane.b32.xlu1 %v4924_v50, %s4398_s1 }
 0xb6a   : > { %1974 = vrot.lane.b32.xlu0 %v4926_v53, %s4398_s1 }
 0xb6d   : > { %3827 = vrot.lane.b32.xlu1 %v3826_v18, %s4398_s1 }
 0xb6e   : > { %3837 = vrot.lane.b32.xlu0 %v3836_v42, %s4397_s18  ;;  %v3888_v42 = vld [vmem:[%s4806_s21] sm:$0xff]   ;;  %s5405_s21 = scalar_lea.vmem %s5340_s6, %s4816_s28  ;;  %s4399_s28 = smov [#allocation14]  }
 0xb71   : > { %3832 = vrot.lane.b32.xlu1 %v3831_v33, %s4398_s1 }
 0xb75   : > { %3842 = vrot.lane.b32.xlu1 %v3841_v56, %s4397_s18 }
 0xbce   : > { %v1954_v31 = vpop.xlane.xlu0 %1953 }
 0xbd0   : > { %v1957_v29 = vpop.xlane.xlu1 %1956 }
 0xbd1   : > { %4040 = vrcp.f32 %v1957_v29 }
 0xbd2   : > { %4042 = vrcp.f32 %v1954_v31 }
 0xbdb   : > { %v4041_v50 = vpop.eup %4040 }
 0xbdc   : > { %v4043_v34 = vpop.eup %4042  ;;  %v1969_v35 = vmul.f32 %v4041_v50, %v4035_v11 }
 0xbdd   : > { %v1968_v14 = vmul.f32 %v4043_v34, %v4033_v8 }
 0xbdf   : > { %v1972_v30 = vpack.c.bf16 %v1969_v35, %v1968_v14 }
 0xbe1   : > { %v1960_v53 = vpop.xlane.xlu0 %1959 }
 0xbe2   : > { %4044 = vrcp.f32 %v1960_v53 }
 0xbe5   : > { %v1963_v16 = vpop.xlane.xlu1 %1962  ;;  %v1975_v18 = vpop.permute.xlu0 %1974 }
 0xbe6   : > { %4046 = vrcp.f32 %v1963_v16  ;;  %3693 = vmatpush3.bf16.msra.mxu1 %v1975_v18 }
 0xbe7   : > { %3704 = vmatprep.subr.bf16.mxu1 %v3888_v42 }
 0xbe9   : > { %v2022_v32 = vpop.permute.xlu1 %2021  ;;  %3695 = vmatmul.mubr.msk.bf16.vlgmr.msra.gmra.mrb[28].mxu1 %vm1201_vm2, %v1972_v30  ;;  %v3838_v5 = vpop.permute.xlu0 %3837 }
 0xbea   : > { %3699 = vmatpush3.bf16.msra.mxu0 %v2022_v32  ;;  %3705 = vmatpush3.bf16.msra.mxu1 %v3888_v42  ;;  %v3840_v7 = vunpack.i.h.bf16 %v3838_v5  ;;  %v3839_v8 = vunpack.i.l.bf16 %v3838_v5 }
 0xbeb   : > { %3706 = vmatprep.subr.bf16.mxu1 %v3889_v44 }
 0xbec   : > { %v4045_v33 = vpop.eup %4044 }
 0xbed   : > { %v1970_v37 = vmul.f32 %v4045_v33, %v4037_v25  ;;  %v3828_v1 = vpop.permute.xlu1 %3827 }
 0xbee   : > { %3707 = vmatpush3.bf16.msra.mxu1 %v3889_v44  ;;  %v3830_v3 = vunpack.i.h.bf16 %v3828_v1  ;;  %v3829_v4 = vunpack.i.l.bf16 %v3828_v1  ;;  %v4089_v44 = vld [vmem:[#allocation14 + $0x8] sm:$0xff] }
 0xbef   : > { %3708 = vmatprep.subr.bf16.mxu1 %v3890_v45 }
 0xbf0   : > { %v4047_v36 = vpop.eup %4046  ;;  %v2117_v39 = vsel %vm1106_vm1, %v4982_v2, %v3830_v3  ;;  %v2116_v6 = vsel %vm1106_vm1, %v4980_v0, %v3829_v4 }
 0xbf1   : > { %v1971_v38 = vmul.f32 %v4047_v36, %v4039_v27  ;;  %v3833_v11 = vpop.permute.xlu1 %3832  ;;  %v2121_v41 = vsel %vm2120_vm3, %v2116_v6, %v3839_v8  ;;  %v2122_v21 = vsel %vm2120_vm3, %v2117_v39, %v3840_v7 }
 0xbf2   : > { %3709 = vmatpush3.bf16.msra.mxu1 %v3890_v45  ;;  %v3835_v0 = vunpack.i.h.bf16 %v3833_v11  ;;  %v3834_v25 = vunpack.i.l.bf16 %v3833_v11 }
 0xbf3   : > { %v1973_v40 = vpack.c.bf16 %v1971_v38, %v1970_v37  ;;  %3710 = vmatprep.subr.bf16.mxu1 %v3891_v46  ;;  %v4088_v38 = vld [vmem:[#allocation14] sm:$0xff] }
 0xbf4   : > { %v2119_v29 = vsel %vm1106_vm1, %v4988_v12, %v3835_v0  ;;  %v2118_v31 = vsel %vm1106_vm1, %v4986_v10, %v3834_v25  ;;  %v3397_v12 = vld [vmem:[%s5405_s21] ss:$0 sm:$0xff]  ;;  %v3916_v0 = vld [vmem:[%s4808_s23 + $0x64] ss:$16 sps:$4 sm:$0xff]  }
 0xbf5   : > { %3701 = vmatmul.mubr.msk.bf16.vlgmr.msra.gmra.mrb[40].mxu0 %vm1201_vm2, %v1973_v40  ;;  %v3843_v23 = vpop.permute.xlu1 %3842  ;;  %v3919_v25 = vld [vmem:[%s4808_s23 + $0x6c] ss:$16 sps:$4 sm:$0xff]  }
 0xbf6   : > { %2570 = vmatprep.mubr.bf16.mxu0 %v4393_v43  ;;  %3711 = vmatpush3.bf16.msra.mxu1 %v3891_v46  ;;  %v3845_v26 = vunpack.i.h.bf16 %v3843_v23  ;;  %v3844_v27 = vunpack.i.l.bf16 %v3843_v23  ;;  %v4090_v46 = vld [vmem:[#allocation14 + $0x10] sm:$0xff]  ;;  %v3911_v23 = vld [vmem:[%s4808_s23 + $0x48] ss:$16 sps:$4 sm:$0xff]  }
 0xbf7   : > { %3712 = vmatprep.subr.bf16.mxu1 %v3892_v47 }
 0xbf8   : > { %v2123_v34 = vsel %vm2120_vm3, %v2118_v31, %v3844_v27  ;;  %v2124_v35 = vsel %vm2120_vm3, %v2119_v29, %v3845_v26  ;;  %v3914_v26 = vld [vmem:[%s4808_s23 + $0x60] ss:$16 sps:$4 sm:$0xff]   ;;  %v3917_v27 = vld [vmem:[%s4808_s23 + $0x68] ss:$16 sps:$4 sm:$0xff]   ;;  %v3925_v29 = vld [vmem:[%s4808_s23 + $0x8c] ss:$16 sps:$4 sm:$0xff]  }
 0xbf9   : > { %v3920_v31 = vld [vmem:[%s4808_s23 + $0x80] ss:$16 sps:$4 sm:$0xff]  }
 0xbfa   : > { %3713 = vmatpush3.bf16.msra.mxu1 %v3892_v47 }
 0xbfb   : > { %3714 = vmatprep.subr.bf16.mxu1 %v3893_v48 }
 0xbfe   : > { %3715 = vmatpush3.bf16.msra.mxu1 %v3893_v48 }
 0xbff   : > { %3716 = vmatprep.subr.bf16.mxu1 %v3894_v49 }
 0xc02   : > { %3717 = vmatpush3.bf16.msra.mxu1 %v3894_v49  ;;  %v4091_v49 = vld [vmem:[#allocation14 + $0x18] sm:$0xff] }
 0xc03   : > { %3718 = vmatprep.subr.bf16.mxu1 %v3895_v17 }
 0xc06   : > { %3719 = vmatpush3.bf16.msra.mxu1 %v3895_v17  ;;  %v3904_v17 = vld [vmem:[%s4808_s23 + $0x24] ss:$16 sps:$4 sm:$0xff]  }
 0xcbc   : > { %v2014_v51 = vpop.f32.mrb[28].mxu1 }
 0xcbd   : > { %v3696_v52 = vpop.f32.mrb[29].mxu1 }
 0xcbe   : > { %v2017_v54 = vpop.f32.mrb[30].mxu1  ;;  %v3896_v52 = vld [vmem:[%s4808_s23] ss:$16 sps:$4 sm:$0xff]  }
 0xcbf   : > { %v3846_v55 = vpack.i.bf16 %v2017_v54, %v2014_v51  ;;  %v3697_v56 = vpop.f32.mrb[31].mxu1  ;;  %v3898_v54 = vld [vmem:[%s4808_s23 + $0x4] ss:$16 sps:$4 sm:$0xff]  }
 0xcc0   : > { %v3901_v56 = vld [vmem:[%s4808_s23 + $0xc] ss:$16 sps:$4 sm:$0xff]   ;;  %2538 = vmatprep.subr.bf16.mxu0 %v3898_v54 }
 0xcc1   : > { %3847 = vrot.lane.b32.xlu0 %v3846_v55, %s4396_s24  ;;  %v3899_v55 = vld [vmem:[%s4808_s23 + $0x8] ss:$16 sps:$4 sm:$0xff]   ;;  %2591 = vmatprep.subr.bf16.mxu1 %v3901_v56 }
 0xcc2   : > { %2539 = vmatpush1.bf16.msra.mxu0 %v3896_v52 }
 0xcc3   : > { %2540 = vmatprep.subr.bf16.mxu0 %v3904_v17 }
 0xcc8   : > { %v2061_v57 = vpop.f32.mrb[40].mxu0 }
 0xcc9   : > { %v3702_v58 = vpop.f32.mrb[41].mxu0 }
 0xcca   : > { %v2064_v59 = vpop.f32.mrb[42].mxu0  ;;  %v3902_v58 = vld [vmem:[%s4808_s23 + $0x20] ss:$16 sps:$4 sm:$0xff]  }
 0xccb   : > { %v3851_v60 = vpack.i.bf16 %v2064_v59, %v2061_v57  ;;  %v3703_v63 = vpop.f32.mrb[43].mxu0  ;;  %v3907_v57 = vld [vmem:[%s4808_s23 + $0x2c] ss:$16 sps:$4 sm:$0xff]   ;;  %v3905_v59 = vld [vmem:[%s4808_s23 + $0x28] ss:$16 sps:$4 sm:$0xff]   ;;  %2541 = vmatpush1.bf16.msra.mxu0 %v3902_v58 }
 0xccd   : > { %3852 = vrot.lane.b32.xlu1 %v3851_v60, %s4396_s24 }
 0xd33   : > { %v3848_v9 = vpop.permute.xlu0 %3847 }
 0xd34   : > { %v3850_v13 = vunpack.i.h.bf16 %v3848_v9  ;;  %v3849_v15 = vunpack.i.l.bf16 %v3848_v9 }
 0xd36   : > { %v2126_v61 = vsel %vm2125_vm4, %v2121_v41, %v3849_v15  ;;  %v2127_v62 = vsel %vm2125_vm4, %v2122_v21, %v3850_v13 }
 0xd37   : > { %v2147_v2 = vpack.c.bf16 %v2127_v62, %v2126_v61  ;;  %v3910_v61 = vld [vmem:[%s4808_s23 + $0x44] ss:$16 sps:$4 sm:$0xff]   ;;  %v3913_v62 = vld [vmem:[%s4808_s23 + $0x4c] ss:$16 sps:$4 sm:$0xff]  }
 0xd38   : > { %2542 = vmatprep.subr.bf16.mxu0 %v3910_v61 }
 0xd39   : > { %3720 = vmatprep.mubr.bf16.mxu1 %v2147_v2  ;;  %v3908_v2 = vld [vmem:[%s4808_s23 + $0x40] ss:$16 sps:$4 sm:$0xff]  }
 0xd3a   : > { %2543 = vmatpush1.bf16.msra.mxu0 %v3908_v2  ;;  %v3948_v2 = vld [vmem:[%s4846_s9 + $0x48] sm:$0xff]  }
 0xd3b   : > { %2544 = vmatprep.subr.bf16.mxu0 %v3916_v0 }
 0xd3e   : > { %2545 = vmatpush1.bf16.msra.mxu0 %v3914_v26  ;;  %v3951_v26 = vld [vmem:[%s4846_s9 + $0x88] sm:$0xff]  }
 0xd3f   : > { %v3853_v28 = vpop.permute.xlu1 %3852 }
 0xd40   : > { %v3855_v50 = vunpack.i.h.bf16 %v3853_v28  ;;  %v3854_v53 = vunpack.i.l.bf16 %v3853_v28  ;;  %v3922_v28 = vld [vmem:[%s4808_s23 + $0x84] ss:$16 sps:$4 sm:$0xff]  }
 0xd41   : > { %2546 = vmatprep.subr.bf16.mxu0 %v3922_v28 }
 0xd42   : > { %v2129_v14 = vsel %vm2125_vm4, %v2124_v35, %v3855_v50  ;;  %v2128_v16 = vsel %vm2125_vm4, %v2123_v34, %v3854_v53  ;;  %v3923_v50 = vld [vmem:[%s4808_s23 + $0x88] ss:$16 sps:$4 sm:$0xff]   ;;  %2547 = vmatpush1.bf16.msra.mxu0 %v3920_v31  ;;  %v3928_v53 = vld [vmem:[%s4808_s23 + $0xa4] ss:$16 sps:$4 sm:$0xff]   ;;  %v3931_v34 = vld [vmem:[%s4808_s23 + $0xac] ss:$16 sps:$4 sm:$0xff]  }
 0xd43   : > { %v2148_v18 = vpack.c.bf16 %v2129_v14, %v2128_v16  ;;  %v3926_v35 = vld [vmem:[%s4808_s23 + $0xa0] ss:$16 sps:$4 sm:$0xff]   ;;  %v3929_v14 = vld [vmem:[%s4808_s23 + $0xa8] ss:$16 sps:$4 sm:$0xff]   ;;  %2548 = vmatprep.subr.bf16.mxu0 %v3928_v53  ;;  %v3934_v16 = vld [vmem:[%s4808_s23 + $0xc4] ss:$16 sps:$4 sm:$0xff]  }
 0xd44   : > { %v3954_v31 = vld [vmem:[%s4846_s9 + $0x10] sm:$0xff]   ;;  %v3956_v53 = vld [vmem:[%s4846_s9 + $0x58] sm:$0xff]  }
 0xd45   : > { %3721 = vmatmul.mubr.bf16.vlgmr.msra.gmra.mrb[32].mxu1 %v2148_v18  ;;  %v3937_v18 = vld [vmem:[%s4808_s23 + $0xcc] ss:$16 sps:$4 sm:$0xff]  }
 0xd46   : > { %2623 = vmatprep.mubr.bf16.mxu1 %v4393_v43  ;;  %2592 = vmatpush1.bf16.msra.mxu1 %v3899_v55 }
 0xd47   : > { %2593 = vmatprep.subr.bf16.mxu1 %v3907_v57  ;;  %2549 = vmatpush1.bf16.msra.mxu0 %v3926_v35  ;;  %v3958_v35 = vld [vmem:[%s4846_s9 + $0x18] sm:$0xff]  }
 0xd48   : > { %2550 = vmatprep.subr.bf16.mxu0 %v3934_v16  ;;  %v3960_v16 = vld [vmem:[%s4846_s9 + $0x60] sm:$0xff]  }
 0xd4a   : > { %2594 = vmatpush1.bf16.msra.mxu1 %v3905_v59 }
 0xd4b   : > { %2595 = vmatprep.subr.bf16.mxu1 %v3913_v62  ;;  %v3946_v62 = vld [vmem:[%s4846_s9] sm:$0xff]  }
 0xd4e   : > { %2596 = vmatpush1.bf16.msra.mxu1 %v3911_v23  ;;  %v3949_v23 = vld [vmem:[%s4846_s9 + $0xc8] sm:$0xff]  }
 0xd4f   : > { %2597 = vmatprep.subr.bf16.mxu1 %v3919_v25 }
 0xd52   : > { %2598 = vmatpush1.bf16.msra.mxu1 %v3917_v27 }
 0xd53   : > { %2599 = vmatprep.subr.bf16.mxu1 %v3925_v29  ;;  %v3953_v29 = vld [vmem:[%s4846_s9 + $0xd0] sm:$0xff]  }
 0xd56   : > { %2600 = vmatpush1.bf16.msra.mxu1 %v3923_v50  ;;  %v3955_v50 = vld [vmem:[%s4846_s9 + $0x90] sm:$0xff]  }
 0xd57   : > { %2601 = vmatprep.subr.bf16.mxu1 %v3931_v34  ;;  %v3957_v34 = vld [vmem:[%s4846_s9 + $0xd8] sm:$0xff]  }
 0xd5a   : > { %2602 = vmatpush1.bf16.msra.mxu1 %v3929_v14  ;;  %v3959_v14 = vld [vmem:[%s4846_s9 + $0x98] sm:$0xff]  }
 0xd5b   : > { %2603 = vmatprep.subr.bf16.mxu1 %v3937_v18  ;;  %v3961_v18 = vld [vmem:[%s4846_s9 + $0xe0] sm:$0xff]  }
 0xe18   : > { %v3722_v10 = vpop.f32.mrb[32].mxu1 }
 0xe19   : > { %v2237_v30 = vpop.f32.mrb[33].mxu1  ;;  %v2246_v37 = vadd.f32 %v3722_v10, %v3397_v12  ;;  %v3935_v10 = vld [vmem:[%s4808_s23 + $0xc8] ss:$16 sps:$4 sm:$0xff]  }
 0xe1a   : > { %v2238_v32 = vadd.f32 %v3397_v12, %v2237_v30  ;;  %v3723_v33 = vpop.f32.mrb[34].mxu1  ;;  %v3940_v30 = vld [vmem:[%s4808_s23 + $0xe4] ss:$16 sps:$4 sm:$0xff]   ;;  %2604 = vmatpush1.bf16.msra.mxu1 %v3935_v10 }
 0xe1b   : > { %v2240_v36 = vpop.f32.mrb[35].mxu1  ;;  %v5138_v47 = vadd.f32 %v4090_v46, %v2246_v37  ;;  %v2249_v48 = vadd.f32 %v3723_v33, %v3397_v12  ;;  %v3938_v33 = vld [vmem:[%s4808_s23 + $0xe0] ss:$16 sps:$4 sm:$0xff]  }
 0xe1c   : > { %v5133_v40 = vadd.f32 %v4088_v38, %v2238_v32  ;;  %v2241_v42 = vadd.f32 %v3397_v12, %v2240_v36  ;;  %v3932_v12 = vld [vmem:[%s4808_s23 + $0xc0] ss:$16 sps:$4 sm:$0xff]   ;;  %v3943_v32 = vld [vmem:[%s4808_s23 + $0xec] ss:$16 sps:$4 sm:$0xff]   ;;  %v3941_v36 = vld [vmem:[%s4808_s23 + $0xe8] ss:$16 sps:$4 sm:$0xff]  }
 0xe1d   : > { %v5142_v51 = vadd.f32 %v4091_v49, %v2249_v48  ;;  %2551 = vmatpush1.bf16.msra.mxu0 %v3932_v12  ;;  %2605 = vmatprep.subr.bf16.mxu1 %v3943_v32  ;;  %v3944_v37 = vld [vmem:[%s4846_s9 + $0x40] sm:$0xff]   ;;  %v3965_v32 = vld [vmem:[%s4846_s9 + $0xe8] sm:$0xff]  }
 0xe1e   : > { %v5135_v45 = vadd.f32 %v4089_v44, %v2241_v42  ;;  %2258 = vadd.xlane.f32.xlu0 %v5133_v40  ;;  %2552 = vmatprep.subr.bf16.mxu0 %v3940_v30  ;;  %v3945_v38 = vld [vmem:[%s4846_s9 + $0xc0] sm:$0xff]   ;;  %v3964_v30 = vld [vmem:[%s4846_s9 + $0x68] sm:$0xff]  }
 0xe1f   : > { %2606 = vmatpush1.bf16.msra.mxu1 %v3941_v36  ;;  %v3962_v12 = vld [vmem:[%s4846_s9 + $0x20] sm:$0xff]   ;;  %v3967_v36 = vld [vmem:[%s4846_s9 + $0xa8] sm:$0xff]  }
 0xe20   : > { %2260 = vadd.xlane.f32.xlu1 %v5135_v45  ;;  %3560 = vmatprep.subr.bf16.mxu1 %v3945_v38  ;;  %v3963_v10 = vld [vmem:[%s4846_s9 + $0xa0] sm:$0xff]   ;;  %v3969_v38 = vld [vmem:[%s4846_s9 + $0xf0] sm:$0xff]  }
 0xe21   : > { %2553 = vmatpush1.bf16.msra.mxu0 %v3938_v33  ;;  %v3966_v33 = vld [vmem:[%s4846_s9 + $0x28] sm:$0xff]  }
 0xe22   : > { %2262 = vadd.xlane.f32.xlu0 %v5138_v47  ;;  %3532 = vmatprep.subr.bf16.mxu0 %v3944_v37  ;;  %v3968_v37 = vld [vmem:[%s4846_s9 + $0x70] sm:$0xff]  }
 0xe26   : > { %2264 = vadd.xlane.f32.xlu0 %v5142_v51 }
 0xeab   : > { %v2259_v60 = vpop.xlane.xlu0 %2258 }
 0xeac   : > { %v2266_v63 = vmul.f32 0.0078125, %v2259_v60  ;;  %v3406_v60 = vld [vmem:[%s720_s20] ss:$0 sm:$0xff] }
 0xead   : > { %v2261_v1 = vpop.xlane.xlu1 %2260 }
 0xeae   : > { %v5154_v3 = vsub.f32 %v5133_v40, %v2266_v63  ;;  %v2267_v4 = vmul.f32 0.0078125, %v2261_v1 }
 0xeaf   : > { %v2263_v5 = vpop.xlane.xlu0 %2262 }
 0xeb0   : > { %v5157_v39 = vsub.f32 %v5135_v45, %v2267_v4  ;;  %v2268_v6 = vmul.f32 0.0078125, %v2263_v5  ;;  %v2274_v7 = vmul.f32 %v5154_v3, %v5154_v3 }
 0xeb2   : > { %v5162_v8 = vsub.f32 %v5138_v47, %v2268_v6  ;;  %2278 = vadd.xlane.f32.xlu0 %v2274_v7  ;;  %v2275_v9 = vmul.f32 %v5157_v39, %v5157_v39  ;;  %v3407_v7 = vld [vmem:[%s723_s16] ss:$0 sm:$0xff]  ;;  %s3107_s16 = sshll.u32 %s4399_s28, 4  ;;  %s3108_s16 = int_to_ptr.vmem [resolvable:$true] %s3107_s16 }
 0xeb3   : > { %v2265_v11 = vpop.xlane.xlu0 %2264  ;;  %s4300_s30 = scalar_lea.vmem %s3108_s16, 512  ;;  %p4307_p4 = scmp.lt.s32.totalorder %s3108_s16, %s3108_s16 }
 0xeb4   : > { %v2269_v13 = vmul.f32 0.0078125, %v2265_v11  ;;  %2280 = vadd.xlane.f32.xlu1 %v2275_v9  ;;  %v2276_v15 = vmul.f32 %v5162_v8, %v5162_v8  ;;  %p4301_p0 = scmp.ne.s32.totalorder %s3108_s16, %s4300_s30  ;;  %p4308_p13 = scmp.lt.s32.totalorder %s4300_s30, %s4300_s30 }
 0xeb6   : > { %v5169_v41 = vsub.f32 %v5142_v51, %v2269_v13  ;;  %2282 = vadd.xlane.f32.xlu0 %v2276_v15  ;;  %p4302_p6 = pnand %p4301_p0, %p3774_p8  ;;  %p4309_p11 = por %p4308_p13, %p4307_p4 }
 0xeb8   : > { %v2277_v21 = vmul.f32 %v5169_v41, %v5169_v41  ;;  %p4303_p3 = pneg %p4302_p6 }
 0xeba   : > { %2284 = vadd.xlane.f32.xlu1 %v2277_v21  ;;  %p4310_p1 = pnand %p4309_p11, %p4303_p3 }
 0xf3f   : > { %v2279_v42 = vpop.xlane.xlu0 %2278 }
 0xf40   : > { %v2286_v44 = vmul.f32 0.0078125, %v2279_v42  ;;  %v3970_v42 = vld [vmem:[%s4846_s9 + $0x30] sm:$0xff]  }
 0xf41   : > { %v2281_v46 = vpop.xlane.xlu1 %2280 }
 0xf42   : > { %v2290_v48 = vadd.f32 1e-06, %v2286_v44  ;;  %v2287_v49 = vmul.f32 0.0078125, %v2281_v46  ;;  %v3971_v44 = vld [vmem:[%s4846_s9 + $0xb0] sm:$0xff]   ;;  %v3972_v46 = vld [vmem:[%s4846_s9 + $0x78] sm:$0xff]  }
 0xf43   : > { %v2283_v52 = vpop.xlane.xlu0 %2282 }
 0xf44   : > { %4048 = vrsqrt.f32 %v2290_v48  ;;  %v2291_v54 = vadd.f32 1e-06, %v2287_v49  ;;  %v2288_v55 = vmul.f32 0.0078125, %v2283_v52  ;;  %v3973_v48 = vld [vmem:[%s4846_s9 + $0xf8] sm:$0xff]  }
 0xf45   : > { %v3974_v49 = vld [vmem:[%s4846_s9 + $0x38] sm:$0xff]  }
 0xf46   : > { %4050 = vrsqrt.f32 %v2291_v54  ;;  %v2292_v56 = vadd.f32 1e-06, %v2288_v55  ;;  %v3975_v52 = vld [vmem:[%s4846_s9 + $0xb8] sm:$0xff]   ;;  %v2372_v55 = vsub.s32 3, %v4906_v19 }
 0xf47   : > { %v2285_v17 = vpop.xlane.xlu1 %2284  ;;  %v2354_v54 = vld [vmem:[%s4840_s5] sm:$0xf] }
 0xf48   : > { %4052 = vrsqrt.f32 %v2292_v56  ;;  %v2289_v57 = vmul.f32 0.0078125, %v2285_v17  ;;  %v2361_v56 = vrot.slane %v2354_v54, %v853_v20  ;;  %v2369_v17 = vrot.slane %v2354_v54, %v861_v24 }
 0xf4a   : > { %v2293_v58 = vadd.f32 1e-06, %v2289_v57  ;;  %v2365_v57 = vrot.slane %v2354_v54, %v857_v22 }
 0xf4c   : > { %4054 = vrsqrt.f32 %v2293_v58  ;;  %v2373_v58 = vrot.slane %v2354_v54, %v2372_v55 }
 0xf4e   : > { %v4049_v59 = vpop.eup %4048 }
 0xf4f   : > { %v2298_v63 = vmul.f32 %v4049_v59, %v5154_v3 }
 0xf50   : > { %v4051_v1 = vpop.eup %4050 }
 0xf51   : > { %v2299_v4 = vmul.f32 %v4051_v1, %v5157_v39  ;;  %v2308_v5 = vmul.f32 %v3406_v60, %v2298_v63  ;;  %v3947_v39 = vld [vmem:[%s4846_s9 + $0x80] sm:$0xff]  }
 0xf52   : > { %v4053_v6 = vpop.eup %4052 }
 0xf53   : > { %v2309_v9 = vmul.f32 %v3406_v60, %v2299_v4  ;;  %v2318_v11 = vadd.f32 %v3407_v7, %v2308_v5  ;;  %v2300_v15 = vmul.f32 %v4053_v6, %v5162_v8 }
 0xf55   : > { %v2319_v13 = vadd.f32 %v3407_v7, %v2309_v9  ;;  %v2310_v0 = vmul.f32 %v3406_v60, %v2300_v15 }
 0xf56   : > { %v4055_v21 = vpop.eup %4054 }
 0xf57   : > { %v2355_v61 = vpack.c.bf16 %v2319_v13, %v2318_v11  ;;  %v2301_v3 = vmul.f32 %v4055_v21, %v5169_v41  ;;  %v3950_v41 = vld [vmem:[%s4846_s9 + $0x8] sm:$0xff]   ;;  %v2320_v27 = vadd.f32 %v3407_v7, %v2310_v0 }
 0xf59   : > { %2571 = vmatmul.mubr.bf16.vlgmr.msra.gmra.mrb[44].mxu0 %v2355_v61  ;;  %2624 = vmatmul.mubr.bf16.vlgmr.msra.gmra.mrb[36].mxu1 %v2355_v61  ;;  %v2311_v25 = vmul.f32 %v3406_v60, %v2301_v3 }
 0xf5a   : > { %2580 = vmatprep.mubr.bf16.mxu0 %v4393_v43  ;;  %2633 = vmatprep.mubr.bf16.mxu1 %v4393_v43  ;;  %v3952_v43 = vld [vmem:[%s4846_s9 + $0x50] sm:$0xff]  }
 0xf5b   : > { %v2321_v8 = vadd.f32 %v3407_v7, %v2311_v25  ;;  %3533 = vmatpush3.bf16.msra.mxu0 %v3946_v62  ;;  %3561 = vmatpush3.bf16.msra.mxu1 %v3947_v39 }
 0xf5c   : > { %3534 = vmatprep.subr.bf16.mxu0 %v3948_v2  ;;  %3562 = vmatprep.subr.bf16.mxu1 %v3949_v23 }
 0xf5d   : > { %v2356_v28 = vpack.c.bf16 %v2321_v8, %v2320_v27 }
 0xf5f   : > { %3535 = vmatpush3.bf16.msra.mxu0 %v3950_v41  ;;  %3563 = vmatpush3.bf16.msra.mxu1 %v3951_v26 }
 0xf60   : > { %3536 = vmatprep.subr.bf16.mxu0 %v3952_v43  ;;  %3564 = vmatprep.subr.bf16.mxu1 %v3953_v29 }
 0xf61   : > { %2581 = vmatmul.mubr.bf16.gmra.mrb[48].mxu0 %v2356_v28  ;;  %2634 = vmatmul.mubr.bf16.gmra.mrb[40].mxu1 %v2356_v28 }
 0xf63   : > { %3537 = vmatpush3.bf16.msra.mxu0 %v3954_v31  ;;  %3565 = vmatpush3.bf16.msra.mxu1 %v3955_v50 }
 0xf64   : > { %3538 = vmatprep.subr.bf16.mxu0 %v3956_v53  ;;  %3566 = vmatprep.subr.bf16.mxu1 %v3957_v34 }
 0xf67   : > { %3539 = vmatpush3.bf16.msra.mxu0 %v3958_v35  ;;  %3567 = vmatpush3.bf16.msra.mxu1 %v3959_v14 }
 0xf68   : > { %3540 = vmatprep.subr.bf16.mxu0 %v3960_v16  ;;  %3568 = vmatprep.subr.bf16.mxu1 %v3961_v18 }
 0xf6b   : > { %3541 = vmatpush3.bf16.msra.mxu0 %v3962_v12  ;;  %3569 = vmatpush3.bf16.msra.mxu1 %v3963_v10 }
 0xf6c   : > { %3542 = vmatprep.subr.bf16.mxu0 %v3964_v30  ;;  %3570 = vmatprep.subr.bf16.mxu1 %v3965_v32 }
 0xf6f   : > { %3543 = vmatpush3.bf16.msra.mxu0 %v3966_v33  ;;  %3571 = vmatpush3.bf16.msra.mxu1 %v3967_v36 }
 0xf70   : > { %3544 = vmatprep.subr.bf16.mxu0 %v3968_v37  ;;  %3572 = vmatprep.subr.bf16.mxu1 %v3969_v38 }
 0xf73   : > { %3545 = vmatpush3.bf16.msra.mxu0 %v3970_v42  ;;  %3573 = vmatpush3.bf16.msra.mxu1 %v3971_v44 }
 0xf74   : > { %3546 = vmatprep.subr.bf16.mxu0 %v3972_v46  ;;  %3574 = vmatprep.subr.bf16.mxu1 %v3973_v48 }
 0xf77   : > { %3547 = vmatpush3.bf16.msra.mxu0 %v3974_v49  ;;  %3575 = vmatpush3.bf16.msra.mxu1 %v3975_v52 }
0x102c   : > { %v2572_v59 = vpop.f32.mrb[44].mxu0  ;;  %v2625_v60 = vpop.f32.mrb[36].mxu1 }
0x102d   : > { %v2573_v63 = vadd.f32 %v2572_v59, %v2361_v56  ;;  %v2626_v1 = vadd.f32 %v2625_v60, %v2369_v17  ;;  %v2574_v4 = vpop.f32.mrb[45].mxu0  ;;  %v2627_v5 = vpop.f32.mrb[37].mxu1 }
0x102e   : > { %v2575_v6 = vadd.f32 %v2574_v4, %v2365_v57  ;;  %v2628_v7 = vadd.f32 %v2627_v5, %v2373_v58  ;;  %v2576_v9 = vpop.f32.mrb[46].mxu0  ;;  %v2629_v11 = vpop.f32.mrb[38].mxu1 }
0x102f   : > { %v2660_v13 = vmul.f32 0.70710677, %v2573_v63  ;;  %v2662_v15 = vmul.f32 0.70710677, %v2626_v1  ;;  %v2577_v24 = vadd.f32 %v2576_v9, %v2361_v56  ;;  %v5253_v61 = vadd.f32 %v2629_v11, %v2369_v17  ;;  %v2578_v19 = vpop.f32.mrb[47].mxu0  ;;  %v2631_v22 = vpop.f32.mrb[39].mxu1 }
0x1030   : > { %v2661_v20 = vmul.f32 0.70710677, %v2575_v6  ;;  %v2663_v21 = vmul.f32 0.70710677, %v2628_v7  ;;  %v2579_v3 = vadd.f32 %v2578_v19, %v2365_v57  ;;  %v5255_v62 = vadd.f32 %v2631_v22, %v2373_v58 }
0x1031   : > { %4056 = verf.f32 %v2660_v13  ;;  %v2664_v39 = vmul.f32 0.70710677, %v2577_v24  ;;  %v2666_v2 = vmul.f32 0.70710677, %v5253_v61  ;;  %v2644_v42 = vmul.f32 0.5, %v2573_v63 }
0x1032   : > { %4058 = verf.f32 %v2662_v15  ;;  %v2665_v23 = vmul.f32 0.70710677, %v2579_v3  ;;  %v2667_v25 = vmul.f32 0.70710677, %v5255_v62  ;;  %v2646_v44 = vmul.f32 0.5, %v2626_v1 }
0x1033   : > { %4060 = verf.f32 %v2661_v20  ;;  %v2645_v52 = vmul.f32 0.5, %v2575_v6  ;;  %v2650_v5 = vmul.f32 0.5, %v5253_v61  ;;  %v2649_v6 = vmul.f32 0.5, %v2579_v3 }
0x1034   : > { %4062 = verf.f32 %v2663_v21  ;;  %v2582_v0 = vpop.f32.mrb[48].mxu0  ;;  %v2635_v41 = vpop.f32.mrb[40].mxu1 }
0x1035   : > { %4064 = verf.f32 %v2664_v39  ;;  %v5259_v8 = vadd.f32 %v2582_v0, %v2361_v56  ;;  %v2584_v26 = vpop.f32.mrb[49].mxu0  ;;  %v5261_v27 = vadd.f32 %v2635_v41, %v2369_v17  ;;  %v2637_v43 = vpop.f32.mrb[41].mxu1 }
0x1036   : > { %4066 = verf.f32 %v2666_v2  ;;  %v5263_v28 = vadd.f32 %v2584_v26, %v2365_v57  ;;  %v2586_v29 = vpop.f32.mrb[50].mxu0  ;;  %v5266_v50 = vadd.f32 %v2637_v43, %v2373_v58  ;;  %v2639_v53 = vpop.f32.mrb[42].mxu1 }
0x1037   : > { %4068 = verf.f32 %v2665_v23  ;;  %v2668_v31 = vmul.f32 0.70710677, %v5259_v8  ;;  %v2588_v34 = vpop.f32.mrb[51].mxu0  ;;  %v2670_v35 = vmul.f32 0.70710677, %v5261_v27  ;;  %v2641_v14 = vpop.f32.mrb[43].mxu1  ;;  %v2587_v12 = vadd.f32 %v2586_v29, %v2361_v56 }
0x1038   : > { %4070 = verf.f32 %v2667_v25  ;;  %v2669_v16 = vmul.f32 0.70710677, %v5263_v28  ;;  %v2671_v18 = vmul.f32 0.70710677, %v5266_v50  ;;  %v5271_v10 = vadd.f32 %v2639_v53, %v2369_v17 }
0x1039   : > { %4072 = verf.f32 %v2668_v31  ;;  %v5273_v30 = vadd.f32 %v2588_v34, %v2365_v57  ;;  %v2672_v36 = vmul.f32 0.70710677, %v2587_v12  ;;  %v5275_v37 = vadd.f32 %v2641_v14, %v2373_v58 }
0x103a   : > { %4074 = verf.f32 %v2670_v35  ;;  %v2674_v46 = vmul.f32 0.70710677, %v5271_v10  ;;  %v2647_v17 = vmul.f32 0.5, %v2628_v7  ;;  %v2648_v57 = vmul.f32 0.5, %v2577_v24 }
0x103b   : > { %v4057_v32 = vpop.eup %4056  ;;  %4076 = verf.f32 %v2669_v16  ;;  %v2673_v54 = vmul.f32 0.70710677, %v5273_v30  ;;  %v2675_v63 = vmul.f32 0.70710677, %v5275_v37  ;;  %v2651_v24 = vmul.f32 0.5, %v5255_v62 }
0x103c   : > { %v4059_v33 = vpop.eup %4058  ;;  %4078 = verf.f32 %v2671_v18  ;;  %v2692_v49 = vadd.f32 1.0, %v4057_v32  ;;  %v2652_v34 = vmul.f32 0.5, %v5259_v8  ;;  %v2654_v14 = vmul.f32 0.5, %v5261_v27 }
0x103d   : > { %v4061_v38 = vpop.eup %4060  ;;  %4080 = verf.f32 %v2672_v36  ;;  %v2694_v56 = vadd.f32 1.0, %v4059_v33  ;;  %v2656_v18 = vmul.f32 0.5, %v2587_v12  ;;  %v2653_v36 = vmul.f32 0.5, %v5263_v28 }
0x103e   : > { %v4063_v48 = vpop.eup %4062  ;;  %4082 = verf.f32 %v2674_v46  ;;  %v2693_v58 = vadd.f32 1.0, %v4061_v38  ;;  %v2708_v13 = vmul.f32 %v2692_v49, %v2644_v42  ;;  %v2658_v38 = vmul.f32 0.5, %v5271_v10 }
0x103f   : > { %v4065_v55 = vpop.eup %4064  ;;  %4084 = verf.f32 %v2673_v54  ;;  %v2695_v4 = vadd.f32 1.0, %v4063_v48  ;;  %v2710_v7 = vmul.f32 %v2694_v56, %v2646_v44  ;;  %v2657_v44 = vmul.f32 0.5, %v5273_v30 }
0x1040   : > { %v4067_v59 = vpop.eup %4066  ;;  %v2696_v60 = vadd.f32 1.0, %v4065_v55  ;;  %4086 = verf.f32 %v2675_v63  ;;  %v2709_v39 = vmul.f32 %v2693_v58, %v2645_v52  ;;  %v2655_v12 = vmul.f32 0.5, %v5266_v50  ;;  %v3440_v50 = vld [vmem:[%s730_s10] ss:$0 sm:$0xff] }
0x1041   : > { %v4069_v1 = vpop.eup %4068  ;;  %v2698_v9 = vadd.f32 1.0, %v4067_v59  ;;  %v2711_v25 = vmul.f32 %v2695_v4, %v2647_v17  ;;  %v2659_v55 = vmul.f32 0.5, %v5275_v37 }
0x1042   : > { %v4071_v11 = vpop.eup %4070  ;;  %v2712_v15 = vmul.f32 %v2696_v60, %v2648_v57  ;;  %v2697_v20 = vadd.f32 1.0, %v4069_v1 }
0x1043   : > { %v2714_v21 = vmul.f32 %v2698_v9, %v2650_v5  ;;  %v2699_v19 = vadd.f32 1.0, %v4071_v11  ;;  %v4073_v22 = vpop.eup %4072 }
0x1044   : > { %v2789_v2 = vpack.c.bf16 %v2712_v15, %v2708_v13  ;;  %v2713_v23 = vmul.f32 %v2697_v20, %v2649_v6  ;;  %v4075_v0 = vpop.eup %4074  ;;  %v2700_v29 = vadd.f32 1.0, %v4073_v22 }
0x1045   : > { %v2791_v41 = vpack.c.bf16 %v2714_v21, %v2710_v7  ;;  %v2715_v61 = vmul.f32 %v2699_v19, %v2651_v24  ;;  %v4077_v26 = vpop.eup %4076  ;;  %v2702_v35 = vadd.f32 1.0, %v4075_v0 }
0x1046   : > { %v2790_v3 = vpack.c.bf16 %v2713_v23, %v2709_v39  ;;  %v4079_v43 = vpop.eup %4078  ;;  %v2701_v16 = vadd.f32 1.0, %v4077_v26  ;;  %v2716_v8 = vmul.f32 %v2700_v29, %v2652_v34 }
0x1047   : > { %v2792_v31 = vpack.c.bf16 %v2715_v61, %v2711_v25  ;;  %v4081_v53 = vpop.eup %4080  ;;  %v2703_v46 = vadd.f32 1.0, %v4079_v43  ;;  %v2718_v27 = vmul.f32 %v2702_v35, %v2654_v14 }
0x1048   : > { %3027 = vmatprep.mubr.bf16.mxu0 %v2790_v3  ;;  %v4083_v62 = vpop.eup %4082  ;;  %v2704_v32 = vadd.f32 1.0, %v4081_v53  ;;  %v2717_v56 = vmul.f32 %v2701_v16, %v2653_v36 }
0x1049   : > { %3076 = vmatprep.mubr.bf16.mxu1 %v2792_v31  ;;  %3028 = vmatmul.mubr.bf16.vlgmr.msra.gmra.mrb[52].mxu0 %v2789_v2  ;;  %v4085_v33 = vpop.eup %4084  ;;  %v2706_v42 = vadd.f32 1.0, %v4083_v62  ;;  %v2719_v59 = vmul.f32 %v2703_v46, %v2655_v12 }
0x104a   : > { %3077 = vmatmul.mubr.bf16.vlgmr.msra.gmra.mrb[44].mxu1 %v2791_v41  ;;  %v2720_v48 = vmul.f32 %v2704_v32, %v2656_v18  ;;  %v2705_v49 = vadd.f32 1.0, %v4085_v33  ;;  %v4087_v52 = vpop.eup %4086 }
0x104b   : > { %v2722_v54 = vmul.f32 %v2706_v42, %v2658_v38  ;;  %v2707_v17 = vadd.f32 1.0, %v4087_v52 }
0x104c   : > { %v2721_v28 = vmul.f32 %v2705_v49, %v2657_v44  ;;  %v2793_v10 = vpack.c.bf16 %v2720_v48, %v2716_v8 }
0x104d   : > { %v2795_v57 = vpack.c.bf16 %v2722_v54, %v2718_v27  ;;  %v2723_v30 = vmul.f32 %v2707_v17, %v2659_v55 }
0x104e   : > { %v2794_v58 = vpack.c.bf16 %v2721_v28, %v2717_v56 }
0x104f   : > { %v2796_v60 = vpack.c.bf16 %v2723_v30, %v2719_v59 }
0x1050   : > { %3035 = vmatprep.mubr.bf16.mxu0 %v2794_v58 }
0x1051   : > { %3036 = vmatmul.mubr.bf16.gmra.mrb[56].mxu0 %v2793_v10  ;;  %3084 = vmatprep.mubr.bf16.mxu1 %v2796_v60 }
0x1052   : > { %3085 = vmatmul.mubr.bf16.gmra.mrb[48].mxu1 %v2795_v57 }
0x111c   : > { %v3548_v63 = vpop.f32.mrb[52].mxu0 }
0x111d   : > { %v3576_v1 = vpop.f32.mrb[44].mxu1  ;;  %v3549_v37 = vpop.f32.mrb[53].mxu0 }
0x111e   : > { %v3550_v4 = vadd.f32 %v3549_v37, %v3548_v63  ;;  %v3577_v5 = vpop.f32.mrb[45].mxu1  ;;  %v3551_v9 = vpop.f32.mrb[54].mxu0 }
0x111f   : > { %v3578_v6 = vadd.f32 %v3577_v5, %v3576_v1  ;;  %v3579_v11 = vpop.f32.mrb[46].mxu1  ;;  %v3552_v13 = vpop.f32.mrb[55].mxu0 }
0x1120   : > { %v3030_v15 = vadd.f32 %v3550_v4, %v3440_v50  ;;  %v3553_v20 = vadd.f32 %v3552_v13, %v3551_v9  ;;  %v3580_v7 = vpop.f32.mrb[47].mxu1 }
0x1121   : > { %v3581_v21 = vadd.f32 %v3580_v7, %v3579_v11 }
0x1122   : > { %v3079_v24 = vadd.f32 %v3578_v6, %v3030_v15  ;;  %v3033_v19 = vadd.f32 %v3553_v20, %v3440_v50 }
0x1124   : > { %v3093_v22 = vadd.f32 %v3079_v24, %v5133_v40  ;;  %v3082_v39 = vadd.f32 %v3581_v21, %v3033_v19  ;;  %v3554_v2 = vpop.f32.mrb[56].mxu0 }
0x1125   : > { %v3555_v0 = vpop.f32.mrb[57].mxu0  ;;  %v3582_v25 = vpop.f32.mrb[48].mxu1 }
0x1126   : > { %3097 = vst [vmem:[#allocation14] sm:$0xff] %v3093_v22  ;;  %v3094_v23 = vadd.f32 %v3082_v39, %v5135_v45  ;;  %v3556_v41 = vadd.f32 %v3555_v0, %v3554_v2  ;;  %v3557_v61 = vpop.f32.mrb[58].mxu0  ;;  %v3583_v26 = vpop.f32.mrb[49].mxu1 }
0x1127   : > { %v3558_v3 = vpop.f32.mrb[59].mxu0  ;;  %v3584_v29 = vadd.f32 %v3583_v26, %v3582_v25  ;;  %v3585_v31 = vpop.f32.mrb[50].mxu1 }
0x1128   : > { %3098 = vst [vmem:[#allocation14 + $0x8] sm:$0xff] %v3094_v23  ;;  %v3038_v43 = vadd.f32 %v3556_v41, %v3440_v50  ;;  %v3559_v53 = vadd.f32 %v3558_v3, %v3557_v61  ;;  %v3586_v34 = vpop.f32.mrb[51].mxu1 }
0x1129   : > { %v3587_v62 = vadd.f32 %v3586_v34, %v3585_v31 }
0x112a   : > { %v3087_v40 = vadd.f32 %v3584_v29, %v3038_v43  ;;  %v3041_v35 = vadd.f32 %v3559_v53, %v3440_v50 }
0x112c   : > { %v3095_v45 = vadd.f32 %v3087_v40, %v5138_v47  ;;  %v3090_v14 = vadd.f32 %v3587_v62, %v3041_v35 }
0x112e   : > { %3099 = vst [vmem:[#allocation14 + $0x10] sm:$0xff] %v3095_v45  ;;  %v3096_v16 = vadd.f32 %v3090_v14, %v5142_v51 }
0x1130   : > { %3100 = vst [vmem:[#allocation14 + $0x18] sm:$0xff] %v3096_v16 }
0x1131   : > { %4313 = shalt.err (!%p4310_p1)
}
0x1132   : > { %s5408_s13 = sld [smem:[#allocation33_spill]] }
0x1138   : > { %s4314_s29 = scalar_lea.hbm %s5408_s13, 512 }
0x1139   : > { %p4315_p2 = scmp.ne.s32.totalorder %s5408_s13, %s4314_s29  ;;  %p4320_p12 = scmp.lt.u32.totalorder %s4314_s29, %s5408_s13 }
0x113b   : > { %p4316_p10 = pnand %p4315_p2, %p3774_p8 }
0x113d   : > { %p4317_p9 = pneg %p4316_p10 }
0x113f   : > { %p4322_p5 = pnand %p4320_p12, %p4317_p9 }
0x1141   : > { %4325 = shalt.err (!%p4322_p5)
}
0x1142   : > { %s4400_s2 = smov 128   ;;  %s4401_s24 = smov 8  }
0x1143   : > { %3745 = dma.vmem_to_hbm [thread:$0]  (%p3774_p8), %s3108_s16, 512, %s5408_s13, [#allocation4], %s4400_s2, %s4400_s2, %s4401_s24  }
0x1144   : > { %4359 = dma.done.wait (%p3774_p8), [#allocation4], 512  }
0x1145   : > { %4361 = vsyncadd (%p3774_p8), [#allocation4], 4294966784 }
0x1146 PF: > { %s5409_s28 = sld [smem:[#allocation21_spill]]  ;;  %s5410_s4 = sld [smem:[#allocation20_spill]] }
0x1147   : > { %s5411_s27 = sld [smem:[#allocation22_spill]]  ;;  %s5412_s25 = smov %s4368_s26 }
0x114c   : > { %p31_p7 = scmp.ge.s32.totalorder %s5409_s28, 4   ;;  %s5413_s26 = smov %s5410_s4 }
0x114e   :  { %33 = sbr.rel (!%p31_p7) target bundleno = 21 (0x15), region = 195 }
0x1155   :  { %3123 = vsyncpa [#allocation3], 1 }
0x1156   :  { %3125 = vsyncpa [#allocation3 + $0x1], 1 }
0x1157   :  { %3126 = vsyncpa [#allocation6], 1 }
0x1158   :  { %3128 = vsyncpa [#allocation6 + $0x1], 1 }
0x1159   :  { %3129 = vsyncpa [#allocation9], 1 }
0x115a   :  { %3131 = vsyncpa [#allocation9 + $0x1], 1 }
0x115b   :  { %3132 = vsyncpa [#allocation12], 1 }
0x115c   :  { %3134 = vsyncpa [#allocation12 + $0x1], 1 }
0x115d   :  { %3135 = vsyncpa [#allocation4], 1 }
0x115e   :  { %3137 = vsyncpa [#allocation4 + $0x1], 1 }

</bundles_post_ra>
